<compile_context>
chip_gen: v7x
topology: tpu7x:2x2x1
jax: 0.10.0
libtpu: 0.0.40
codegen_flags: <defaults>
</compile_context>

<pallas_src>
import math

import jax
import jax.numpy as jnp
from jax import lax
from jax.experimental import pallas as pl
from jax.experimental.pallas import tpu as pltpu


def _fused_eq_conv_kernel(x_ref, w_ref, b_ref, o_ref, patches_ref):
    # x_ref:       (th+2, W+2, C_in)  bf16 padded input strip (1-px halo)
    # w_ref:       (9*C_in, cpt)      bf16 weights, He constant pre-folded,
    #                                 K ordered (kh, kw, ci)
    # b_ref:       (1, cpt)           f32 bias, He constant pre-folded
    # o_ref:       (th*W, cpt)        output tile, row-major over (h, w)
    # patches_ref: (th, W, 9*C_in)    bf16 VMEM scratch: in-kernel im2col lhs
    th, W, K9 = patches_ref.shape
    c_in = K9 // 9

    # In-kernel im2col: lay the 9 shifted views of the strip side by side along
    # the contraction (lane) axis.  kh offsets live on the untiled leading dim
    # (free address math); the kw offsets are sublane-shifted copies whose
    # load/store cost overlaps the single MXU matmul below.
    for kh in range(3):
        for kw in range(3):
            k0 = (kh * 3 + kw) * c_in
            patches_ref[:, :, k0:k0 + c_in] = x_ref[kh:kh + th, kw:kw + W, :]

    # One big matmul: M = th*W, K = 9*C_in, N = cpt.  f32 accumulation on the
    # MXU, bias added once, single cast, single lane-dense store.
    lhs = patches_ref[...].reshape(th * W, K9)
    acc = jnp.dot(lhs, w_ref[...], preferred_element_type=jnp.float32)
    o_ref[...] = (acc + b_ref[...]).astype(o_ref.dtype)


def _vmem_budget_bytes():
    """Per-generation VMEM budget: ~75% of physical, capped at 100 MiB.

    v7x (64 MiB/TC) -> ~48 MiB (headroom for double-buffering + compiler
    scratch); v5e/v6e (128 MiB) -> ~96 MiB so blocks can grow.
    """
    cap = 64 * 1024 * 1024  # conservative fallback = v7x per-core VMEM
    try:
        info = pltpu.get_tpu_info()
        cap = int(getattr(info, "vmem_capacity_bytes", cap))
    except Exception:
        pass
    return min((cap * 3) // 4, 100 * 1024 * 1024)


def _pick_cout_tiling(c_out):
    """Return (Cp, cpt, n_ct): padded C_out, per-step C_out tile, #tiles."""
    if c_out <= 256:
        # Single full-width tile.  For small C_out (high-res ProGAN layers)
        # this avoids padding to 128: less HBM writeback, no post-kernel slice.
        return c_out, c_out, 1
    if c_out % 128 == 0:
        cpt = 256 if c_out % 256 == 0 else 128
        return c_out, cpt, c_out // cpt
    cp = -(-c_out // 128) * 128
    return cp, 128, cp // 128


def _pick_row_tile(H, W, c_in, cpt, n_ct, N, out_itemsize, budget):
    """Largest divisor of H whose per-step VMEM footprint fits the budget."""
    k9 = 9 * c_in

    def est(th):
        x_blk = (th + 2) * (W + 2) * c_in * 2          # bf16 input strip
        o_blk = th * W * cpt * out_itemsize            # output tile
        w_blk = k9 * cpt * 2                           # bf16 weights tile
        b_blk = cpt * 4
        patches = th * W * k9 * 2                      # im2col scratch
        acc = th * W * cpt * 4                         # f32 matmul result
        return 2 * (x_blk + o_blk + w_blk + b_blk) + patches + acc

    divisors = [d for d in range(1, H + 1) if H % d == 0]
    feasible = [d for d in divisors if est(d) <= budget] or [1]
    th = feasible[-1]
    if N * n_ct == 1:
        # v7x has 2 TensorCores: keep >= 2 parallel grid steps when the batch
        # and channel-tile axes do not already provide them.
        smaller = [d for d in feasible if H // d >= 2]
        if smaller:
            th = smaller[-1]
    return th


def equalized_conv2d_nhwc(x_nhwc, weight, bias, *, equalized=True, row_tile=None):
    """Fused equalized 3x3 conv (stride 1, pad 1): (N,H,W,C_in) -> (N,H,W,C_out)."""
    N, H, W, C_in = x_nhwc.shape
    C_out, C_in_w, kH, kW = weight.shape
    assert (kH, kW) == (3, 3) and C_in_w == C_in

    fan_in = C_in * kH * kW
    he = math.sqrt(2.0 / fan_in) if equalized else 1.0

    out_dtype = x_nhwc.dtype
    itemsize = jnp.dtype(out_dtype).itemsize
    K9 = 9 * C_in

    Cp, cpt, n_ct = _pick_cout_tiling(C_out)
    budget = _vmem_budget_bytes()
    if row_tile is not None and H % int(row_tile) == 0:
        th = int(row_tile)
    else:
        th = _pick_row_tile(H, W, C_in, cpt, n_ct, N, itemsize, budget)
    n_strips = H // th                      # th divides H -> no padded rows
    M = th * W
    B = N * n_strips

    # ---- input: pad once (bf16); restack only when row strips overlap ----
    xb = x_nhwc.astype(jnp.bfloat16)
    xp = jnp.pad(xb, ((0, 0), (1, 1), (1, 1), (0, 0)))       # (N, H+2, W+2, C_in)
    if n_strips == 1:
        strips = xp
    else:
        # TODO(synk): replace this halo restack (~(th+2)/th extra input bytes)
        # with element-granularity overlapping-window indexing; th is chosen
        # as large as VMEM allows so the duplication stays small.
        strips = jnp.stack(
            [xp[:, i * th:i * th + th + 2] for i in range(n_strips)], axis=1)
        strips = strips.reshape(B, th + 2, W + 2, C_in)

    # ---- weights / bias: fold He constant, flatten taps into K = 9*C_in ----
    w_t = jnp.transpose(weight, (2, 3, 1, 0)).astype(jnp.float32) * he  # (3,3,Ci,Co)
    w_t = jnp.pad(w_t, ((0, 0), (0, 0), (0, 0), (0, Cp - C_out)))
    w_t = w_t.reshape(K9, Cp).astype(jnp.bfloat16)
    b_t = jnp.pad(bias.astype(jnp.float32) * he, (0, Cp - C_out)).reshape(1, Cp)

    cost = pl.CostEstimate(
        flops=2 * B * M * K9 * Cp,
        transcendentals=0,
        bytes_accessed=int(n_ct * strips.size * 2 + w_t.size * 2 + b_t.size * 4
                           + B * M * Cp * itemsize),
    )

    out = pl.pallas_call(
        _fused_eq_conv_kernel,
        out_shape=jax.ShapeDtypeStruct((B, M, Cp), out_dtype),
        grid=(n_ct, B),  # c outer (weights fetched once per C_out tile), b inner
        in_specs=[
            pl.BlockSpec((None, th + 2, W + 2, C_in), lambda c, b: (b, 0, 0, 0)),
            pl.BlockSpec((K9, cpt), lambda c, b: (0, c)),
            pl.BlockSpec((1, cpt), lambda c, b: (0, c)),
        ],
        out_specs=pl.BlockSpec((None, M, cpt), lambda c, b: (b, 0, c)),
        scratch_shapes=[pltpu.VMEM((th, W, K9), jnp.bfloat16)],
        compiler_params=pltpu.CompilerParams(
            dimension_semantics=("parallel", "parallel"),
            vmem_limit_bytes=budget,
        ),
        cost_estimate=cost,
    )(strips, w_t, b_t)

    # (N*n_strips, th*W, Cp) -> (N, H, W, Cp): pure metadata reshape.
    out = out.reshape(N, H, W, Cp)
    if Cp != C_out:
        out = out[..., :C_out]
    return out


def equalized_conv2d(x_nchw, weight, bias, *, equalized=True, row_tile=None):
    """PyTorch-layout wrapper (NCHW in / NCHW out), matching Equalized_layer.forward."""
    y = equalized_conv2d_nhwc(jnp.transpose(x_nchw, (0, 2, 3, 1)), weight, bias,
                              equalized=equalized, row_tile=row_tile)
    return jnp.transpose(y, (0, 3, 1, 2))


if __name__ == "__main__":
    key = jax.random.PRNGKey(0)
    kx, kw = jax.random.split(key)

    N, C_in, C_out, H, W = 2, 4, 8, 16, 16

    x = jax.random.normal(kx, (N, C_in, H, W), dtype=jnp.float32)
    # Equalized init: weight ~ N(0, 1), bias = 0 (deterministic).
    weight = jax.random.normal(kw, (C_out, C_in, 3, 3), dtype=jnp.float32)
    bias = jnp.zeros((C_out,), dtype=jnp.float32)

    out = equalized_conv2d(x, weight, bias, equalized=True)
    jax.block_until_ready(out)
    assert out.shape == (N, C_out, H, W)

    # Reference: identical math (He constant folded into weights/bias), using
    # the same bf16-rounded operands the kernel consumes, accumulated in f32.
    # NOTE: bf16 MXU inputs are an intentional precision contract (GAN training).
    he = math.sqrt(2.0 / (C_in * 3 * 3))
    xb = x.astype(jnp.bfloat16).astype(jnp.float32)
    wb = (weight * he).astype(jnp.bfloat16).astype(jnp.float32)
    ref = lax.conv_general_dilated(
        xb, wb, window_strides=(1, 1), padding=((1, 1), (1, 1)),
        dimension_numbers=("NCHW", "OIHW", "NCHW"),
        precision=lax.Precision.HIGHEST,
    ) + (bias * he).reshape(1, C_out, 1, 1)
    assert jnp.allclose(out, ref, atol=1e-3, rtol=1e-3), float(jnp.max(jnp.abs(out - ref)))

    print("KERNEL_OK")
</pallas_src>

<mosaic_0001>
module attributes {stable_mosaic.version = 11 : i64} {
  func.func @_fused_eq_conv_kernel(%arg0: i32, %arg1: i32, %arg2: memref<1x18x18x4xbf16, #tpu.memory_space<vmem>>, %arg3: memref<36x8xbf16, #tpu.memory_space<vmem>>, %arg4: memref<1x8xf32, #tpu.memory_space<vmem>>, %arg5: memref<1x256x8xf32, #tpu.memory_space<vmem>>, %arg6: memref<16x16x36xbf16, #tpu.memory_space<vmem>>) attributes {dimension_semantics = [#tpu.dimension_semantics<parallel>, #tpu.dimension_semantics<parallel>], iteration_bounds = array<i64: 1, 2>, scalar_prefetch = 0 : i64, scratch_operands = 1 : i64, tpu.core_type = #tpu.core_type<tc>, window_params = [{transform_indices = @transform_0, window_bounds = array<i64: 1, 18, 18, 4>}, {transform_indices = @transform_1, window_bounds = array<i64: 36, 8>}, {transform_indices = @transform_2, window_bounds = array<i64: 1, 8>}, {transform_indices = @transform_3, window_bounds = array<i64: 1, 256, 8>}]} {
    %c0 = arith.constant 0 : index
    %c0_0 = arith.constant 0 : index
    %c0_1 = arith.constant 0 : index
    %c0_2 = arith.constant 0 : index
    %0 = vector.load %arg2[%c0, %c0_0, %c0_1, %c0_2] : memref<1x18x18x4xbf16, #tpu.memory_space<vmem>>, vector<1x16x16x4xbf16>
    %1 = vector.shape_cast %0 : vector<1x16x16x4xbf16> to vector<16x16x4xbf16>
    %c0_3 = arith.constant 0 : index
    %c0_4 = arith.constant 0 : index
    %c0_5 = arith.constant 0 : index
    %2 = vector.load %arg6[%c0_3, %c0_4, %c0_5] : memref<16x16x36xbf16, #tpu.memory_space<vmem>>, vector<16x16x4xbf16>
    tpu.vector_store %arg6[%c0_3, %c0_4, %c0_5], %1 {strides = array<i32>} : memref<16x16x36xbf16, #tpu.memory_space<vmem>>, vector<16x16x4xbf16>,
    %c0_6 = arith.constant 0 : index
    %c0_7 = arith.constant 0 : index
    %c1 = arith.constant 1 : index
    %c0_8 = arith.constant 0 : index
    %3 = vector.load %arg2[%c0_6, %c0_7, %c1, %c0_8] : memref<1x18x18x4xbf16, #tpu.memory_space<vmem>>, vector<1x16x16x4xbf16>
    %4 = vector.shape_cast %3 : vector<1x16x16x4xbf16> to vector<16x16x4xbf16>
    %c0_9 = arith.constant 0 : index
    %c0_10 = arith.constant 0 : index
    %c4 = arith.constant 4 : index
    %5 = vector.load %arg6[%c0_9, %c0_10, %c4] : memref<16x16x36xbf16, #tpu.memory_space<vmem>>, vector<16x16x4xbf16>
    tpu.vector_store %arg6[%c0_9, %c0_10, %c4], %4 {strides = array<i32>} : memref<16x16x36xbf16, #tpu.memory_space<vmem>>, vector<16x16x4xbf16>,
    %c0_11 = arith.constant 0 : index
    %c0_12 = arith.constant 0 : index
    %c2 = arith.constant 2 : index
    %c0_13 = arith.constant 0 : index
    %6 = vector.load %arg2[%c0_11, %c0_12, %c2, %c0_13] : memref<1x18x18x4xbf16, #tpu.memory_space<vmem>>, vector<1x16x16x4xbf16>
    %7 = vector.shape_cast %6 : vector<1x16x16x4xbf16> to vector<16x16x4xbf16>
    %c0_14 = arith.constant 0 : index
    %c0_15 = arith.constant 0 : index
    %c8 = arith.constant 8 : index
    %8 = vector.load %arg6[%c0_14, %c0_15, %c8] : memref<16x16x36xbf16, #tpu.memory_space<vmem>>, vector<16x16x4xbf16>
    tpu.vector_store %arg6[%c0_14, %c0_15, %c8], %7 {strides = array<i32>} : memref<16x16x36xbf16, #tpu.memory_space<vmem>>, vector<16x16x4xbf16>,
    %c0_16 = arith.constant 0 : index
    %c1_17 = arith.constant 1 : index
    %c0_18 = arith.constant 0 : index
    %c0_19 = arith.constant 0 : index
    %9 = vector.load %arg2[%c0_16, %c1_17, %c0_18, %c0_19] : memref<1x18x18x4xbf16, #tpu.memory_space<vmem>>, vector<1x16x16x4xbf16>
    %10 = vector.shape_cast %9 : vector<1x16x16x4xbf16> to vector<16x16x4xbf16>
    %c0_20 = arith.constant 0 : index
    %c0_21 = arith.constant 0 : index
    %c12 = arith.constant 12 : index
    %11 = vector.load %arg6[%c0_20, %c0_21, %c12] : memref<16x16x36xbf16, #tpu.memory_space<vmem>>, vector<16x16x4xbf16>
    tpu.vector_store %arg6[%c0_20, %c0_21, %c12], %10 {strides = array<i32>} : memref<16x16x36xbf16, #tpu.memory_space<vmem>>, vector<16x16x4xbf16>,
    %c0_22 = arith.constant 0 : index
    %c1_23 = arith.constant 1 : index
    %c1_24 = arith.constant 1 : index
    %c0_25 = arith.constant 0 : index
    %12 = vector.load %arg2[%c0_22, %c1_23, %c1_24, %c0_25] : memref<1x18x18x4xbf16, #tpu.memory_space<vmem>>, vector<1x16x16x4xbf16>
    %13 = vector.shape_cast %12 : vector<1x16x16x4xbf16> to vector<16x16x4xbf16>
    %c0_26 = arith.constant 0 : index
    %c0_27 = arith.constant 0 : index
    %c16 = arith.constant 16 : index
    %14 = vector.load %arg6[%c0_26, %c0_27, %c16] : memref<16x16x36xbf16, #tpu.memory_space<vmem>>, vector<16x16x4xbf16>
    tpu.vector_store %arg6[%c0_26, %c0_27, %c16], %13 {strides = array<i32>} : memref<16x16x36xbf16, #tpu.memory_space<vmem>>, vector<16x16x4xbf16>,
    %c0_28 = arith.constant 0 : index
    %c1_29 = arith.constant 1 : index
    %c2_30 = arith.constant 2 : index
    %c0_31 = arith.constant 0 : index
    %15 = vector.load %arg2[%c0_28, %c1_29, %c2_30, %c0_31] : memref<1x18x18x4xbf16, #tpu.memory_space<vmem>>, vector<1x16x16x4xbf16>
    %16 = vector.shape_cast %15 : vector<1x16x16x4xbf16> to vector<16x16x4xbf16>
    %c0_32 = arith.constant 0 : index
    %c0_33 = arith.constant 0 : index
    %c20 = arith.constant 20 : index
    %17 = vector.load %arg6[%c0_32, %c0_33, %c20] : memref<16x16x36xbf16, #tpu.memory_space<vmem>>, vector<16x16x4xbf16>
    tpu.vector_store %arg6[%c0_32, %c0_33, %c20], %16 {strides = array<i32>} : memref<16x16x36xbf16, #tpu.memory_space<vmem>>, vector<16x16x4xbf16>,
    %c0_34 = arith.constant 0 : index
    %c2_35 = arith.constant 2 : index
    %c0_36 = arith.constant 0 : index
    %c0_37 = arith.constant 0 : index
    %18 = vector.load %arg2[%c0_34, %c2_35, %c0_36, %c0_37] : memref<1x18x18x4xbf16, #tpu.memory_space<vmem>>, vector<1x16x16x4xbf16>
    %19 = vector.shape_cast %18 : vector<1x16x16x4xbf16> to vector<16x16x4xbf16>
    %c0_38 = arith.constant 0 : index
    %c0_39 = arith.constant 0 : index
    %c24 = arith.constant 24 : index
    %20 = vector.load %arg6[%c0_38, %c0_39, %c24] : memref<16x16x36xbf16, #tpu.memory_space<vmem>>, vector<16x16x4xbf16>
    tpu.vector_store %arg6[%c0_38, %c0_39, %c24], %19 {strides = array<i32>} : memref<16x16x36xbf16, #tpu.memory_space<vmem>>, vector<16x16x4xbf16>,
    %c0_40 = arith.constant 0 : index
    %c2_41 = arith.constant 2 : index
    %c1_42 = arith.constant 1 : index
    %c0_43 = arith.constant 0 : index
    %21 = vector.load %arg2[%c0_40, %c2_41, %c1_42, %c0_43] : memref<1x18x18x4xbf16, #tpu.memory_space<vmem>>, vector<1x16x16x4xbf16>
    %22 = vector.shape_cast %21 : vector<1x16x16x4xbf16> to vector<16x16x4xbf16>
    %c0_44 = arith.constant 0 : index
    %c0_45 = arith.constant 0 : index
    %c28 = arith.constant 28 : index
    %23 = vector.load %arg6[%c0_44, %c0_45, %c28] : memref<16x16x36xbf16, #tpu.memory_space<vmem>>, vector<16x16x4xbf16>
    tpu.vector_store %arg6[%c0_44, %c0_45, %c28], %22 {strides = array<i32>} : memref<16x16x36xbf16, #tpu.memory_space<vmem>>, vector<16x16x4xbf16>,
    %c0_46 = arith.constant 0 : index
    %c2_47 = arith.constant 2 : index
    %c2_48 = arith.constant 2 : index
    %c0_49 = arith.constant 0 : index
    %24 = vector.load %arg2[%c0_46, %c2_47, %c2_48, %c0_49] : memref<1x18x18x4xbf16, #tpu.memory_space<vmem>>, vector<1x16x16x4xbf16>
    %25 = vector.shape_cast %24 : vector<1x16x16x4xbf16> to vector<16x16x4xbf16>
    %c0_50 = arith.constant 0 : index
    %c0_51 = arith.constant 0 : index
    %c32 = arith.constant 32 : index
    %26 = vector.load %arg6[%c0_50, %c0_51, %c32] : memref<16x16x36xbf16, #tpu.memory_space<vmem>>, vector<16x16x4xbf16>
    tpu.vector_store %arg6[%c0_50, %c0_51, %c32], %25 {strides = array<i32>} : memref<16x16x36xbf16, #tpu.memory_space<vmem>>, vector<16x16x4xbf16>,
    %c0_52 = arith.constant 0 : index
    %c0_53 = arith.constant 0 : index
    %c0_54 = arith.constant 0 : index
    %27 = vector.load %arg6[%c0_52, %c0_53, %c0_54] : memref<16x16x36xbf16, #tpu.memory_space<vmem>>, vector<16x16x36xbf16>
    %28 = vector.shape_cast %27 : vector<16x16x36xbf16> to vector<256x36xbf16>
    %c0_55 = arith.constant 0 : index
    %c0_56 = arith.constant 0 : index
    %29 = vector.load %arg3[%c0_55, %c0_56] : memref<36x8xbf16, #tpu.memory_space<vmem>>, vector<36x8xbf16>
    %cst = arith.constant dense<0.000000e+00> : vector<256x8xf32>
    %30 = tpu.matmul %28, %29, %cst {dimension_numbers = #tpu.dot_dimension_numbers<[1], [0], [0], [1], [0, 0, 1, 1], [], []>} : vector<256x36xbf16>, vector<36x8xbf16>, vector<256x8xf32> -> vector<256x8xf32>
    %c0_57 = arith.constant 0 : index
    %c0_58 = arith.constant 0 : index
    %31 = vector.load %arg4[%c0_57, %c0_58] : memref<1x8xf32, #tpu.memory_space<vmem>>, vector<1x8xf32>
    %32 = vector.broadcast %31 : vector<1x8xf32> to vector<256x8xf32>
    %33 = arith.addf %30, %32 : vector<256x8xf32>
    %c0_59 = arith.constant 0 : index
    %c0_60 = arith.constant 0 : index
    %c0_61 = arith.constant 0 : index
    %34 = vector.load %arg5[%c0_59, %c0_60, %c0_61] : memref<1x256x8xf32, #tpu.memory_space<vmem>>, vector<1x256x8xf32>
    %35 = vector.shape_cast %34 : vector<1x256x8xf32> to vector<256x8xf32>
    %36 = vector.shape_cast %33 : vector<256x8xf32> to vector<1x256x8xf32>
    tpu.vector_store %arg5[%c0_59, %c0_60, %c0_61], %36 {strides = array<i32>} : memref<1x256x8xf32, #tpu.memory_space<vmem>>, vector<1x256x8xf32>,
    return
  }
  func.func @transform_0(%arg0: i32, %arg1: i32) -> (i32, i32, i32, i32) {
    %c0_i32 = arith.constant 0 : i32
    %c0_i32_0 = arith.constant 0 : i32
    %c0_i32_1 = arith.constant 0 : i32
    %c0_i32_2 = arith.constant 0 : i32
    return %arg1, %c0_i32, %c0_i32_0, %c0_i32_1 : i32, i32, i32, i32
  }
  func.func @transform_1(%arg0: i32, %arg1: i32) -> (i32, i32) {
    %c0_i32 = arith.constant 0 : i32
    %c0_i32_0 = arith.constant 0 : i32
    return %c0_i32, %arg0 : i32, i32
  }
  func.func @transform_2(%arg0: i32, %arg1: i32) -> (i32, i32) {
    %c0_i32 = arith.constant 0 : i32
    %c0_i32_0 = arith.constant 0 : i32
    return %c0_i32, %arg0 : i32, i32
  }
  func.func @transform_3(%arg0: i32, %arg1: i32) -> (i32, i32, i32) {
    %c0_i32 = arith.constant 0 : i32
    %c0_i32_0 = arith.constant 0 : i32
    return %arg1, %c0_i32, %arg0 : i32, i32, i32
  }
}

</mosaic_0001>

<bundles_post_ra>
// kernel: tpu_custom_call.1
= control target key start
LH: loop header
LB: loop body
LE: loop exit
PB: predicated region body
PF: predicated region fallthrough
CT: control target
= control target key end

     0   :  { %s4209_s12 = smov 0   ;;  %s4211_s13 = smov 0   ;;  %s4996_s0 = inlined_call_operand.vmem [shape: bf16[2,18,18,4], index: 0, kind: input, shape index: {}]   ;;  %s4997_s1 = inlined_call_operand.vmem [shape: bf16[36,8], index: 1, kind: input, shape index: {}]   ;;  %s4998_s2 = inlined_call_operand.vmem [shape: f32[1,8], index: 2, kind: input, shape index: {}]   ;;  %s4999_s3 = inlined_call_operand.vmem [shape: f32[2,256,8], index: 3, kind: output, shape index: {}]  }
   0x1   :  { %s4213_s14 = smov 0  }
   0x2 LB: > { %s22_s15 = sadd.s32 1, %s4175_s13  ;;  %p3293_p0 = scmp.ge.s32.totalorder %s4179_s14, 1  ;;  %s4179_s14 = sphi %s4213_s14, %s13_s14   ;;  %s4175_s13 = sphi %s4211_s13, %s5001_s13   ;;  %s4171_s12 = sphi %s4209_s12, %s5000_s12  }
   0x3   : > { %p23_p1 = scmp.ge.s32.totalorder %s22_s15, 2  ;;  %p168_p2 = scmp.lt.s32.totalorder %s4179_s14, 3 }
   0x5   : > { %s5003_s15 = smov (%p23_p1, %s22_s15), 0  ;;  %p169_p3 = pnand %p3293_p0, %p168_p2 }
   0x6   : > { %p202_p4 = scmp.lt.s32.totalorder (!%p169_p3), %s4171_s12, 1  ;;  %vm978_vm0 = vcmask (!%p169_p3), 1046528   ;;  %s4181_s20 = smov (!%p169_p3), 12   ;;  %vm544_vm1 = vsmask.f32 (!%p169_p3), 7424  ;;  %vm351_vm2 = vcmask (!%p169_p3), 31744  }
   0x7   : > { %172 = sbr.rel (%p169_p3) target bundleno = 613 (0x265), region = 32  ;;  %s4182_s21 = smov (!%p169_p3), 8   ;;  %vm785_vm3 = vcmask (!%p169_p3), 64544   ;;  %vm1075_vm4 = vcmask (!%p169_p3), 97344   ;;  %vm1253_vm5 = vcmask (!%p169_p3), 130144   ;;  %vm1686_vm6 = vcmask (!%p169_p3), 162944  }
   0x8   : > { %s4183_s22 = smov (!%p169_p3), 4   ;;  %s4184_s23 = smov (!%p169_p3), 16   ;;  %vm1975_vm7 = vcmask (!%p169_p3), 195744   ;;  %vm2153_vm8 = vcmask (!%p169_p3), 228544   ;;  %vm2586_vm9 = vcmask (!%p169_p3), 261344   ;;  %vm2875_vm10 = vcmask (!%p169_p3), 294144  }
   0x9   : > { %s4185_s24 = smov (!%p169_p3), 20   ;;  %s4186_s25 = smov (!%p169_p3), 24   ;;  %vm2935_vm11 = vcmask (!%p169_p3), 293888   ;;  %vm2984_vm12 = vcmask (!%p169_p3), 1041408   ;;  %vm3149_vm13 = vcmask (!%p169_p3), 64512  }
   0xa   : > { %s4187_s26 = smov (!%p169_p3), 28   ;;  %s4188_s27 = smov (!%p169_p3), 32  }
   0xe   : > { %s5005_s12 = smov (!%p202_p4, %s4171_s12), 1 }
   0xf   : > { %s3881_s16 = smul.u32 216, %s5005_s12  ;;  %s3815_s7 = sshll.u32 %s5005_s12, 8 }
  0x11   : > { %s4233_s19 = scalar_lea.vmem %s4996_s0, %s3881_s16  ;;  %s4889_s16 = scalar_lea.vmem %s4999_s3, %s3815_s7 }
  0x12   : > { %v3914_v0 = vld [vmem:[%s4233_s19 + $0x6c] sm:$0xff]   ;;  %v3916_v2 = vld [vmem:[%s4233_s19 + $0x60] sm:$0xfe]   ;;  %v3917_v3 = vld [vmem:[%s4233_s19 + $0x68] ss:$0 sps:$4 sm:$0x11]  }
  0x13   : > { %v3915_v1 = vld [vmem:[%s4233_s19 + $0xc] sm:$0xff]   ;;  %1221 = vrot.lane.b32.xlu1 %v3914_v0, %s4181_s20  ;;  %v1003_v5 = vrot.slane %v3916_v2, 1  ;;  %v1004_v6 = vrot.slane %v3917_v3, 1  ;;  %v3918_v7 = vld [vmem:[%s4233_s19] sm:$0xfe]   ;;  %v3932_v58 = vld [vmem:[%s4233_s19 + $0x78] sm:$0xff]  }
  0x14   : > { %1205 = vrot.lane.b32.xlu0 %v3915_v1, %s4181_s20  ;;  %v3924_v4 = vld [vmem:[%s4233_s19 + $0xc] sm:$0xff]   ;;  %v3919_v8 = vld [vmem:[%s4233_s19 + $0x8] ss:$0 sps:$4 sm:$0x11]   ;;  %v979_v11 = vrot.slane %v3918_v7, 1  ;;  %v3926_v26 = vld [vmem:[%s4233_s19] sm:$0xff]  }
  0x15   : > { %v558_v9 = vshrl.u32 %v3924_v4, 16  ;;  %v1005_v10 = vsel %vm978_vm0, %v1003_v5, %v1004_v6  ;;  %v3920_v12 = vld [vmem:[%s4233_s19 + $0x6c] sm:$0xfe]   ;;  %v560_v13 = vshll.u32 %v3924_v4, 16  ;;  %v980_v14 = vrot.slane %v3919_v8, 1  ;;  %v3930_v38 = vld [vmem:[%s4233_s19 + $0x60] sm:$0xff]  }
  0x16   : > { %v3921_v15 = vld [vmem:[%s4233_s19 + $0x74] ss:$0 sps:$4 sm:$0x11]   ;;  %v1006_v16 = vrot.slane %v3920_v12, 1  ;;  %v3922_v20 = vld [vmem:[%s4233_s19 + $0xc] sm:$0xfe]  }
  0x17   : > { %1043 = vrot.lane.b32.xlu1 %v1005_v10, %s4182_s21  ;;  %v562_v17 = vrot.slane %v560_v13, 1  ;;  %v981_v18 = vsel %vm978_vm0, %v979_v11, %v980_v14  ;;  %v1007_v19 = vrot.slane %v3921_v15, 1  ;;  %v3923_v21 = vld [vmem:[%s4233_s19 + $0x14] ss:$0 sps:$4 sm:$0x11]   ;;  %v982_v23 = vrot.slane %v3922_v20, 1 }
  0x18   : > { %1027 = vrot.lane.b32.xlu0 %v981_v18, %s4182_s21  ;;  %v983_v24 = vrot.slane %v3923_v21, 1  ;;  %v3925_v25 = vld [vmem:[%s4233_s19 + $0x14] ss:$0 sps:$4 sm:$0x11]   ;;  %v546_v31 = vshrl.u32 %v3926_v26, 16  ;;  %v548_v32 = vshll.u32 %v3926_v26, 16 }
  0x19   : > { %v1008_v22 = vsel %vm978_vm0, %v1006_v16, %v1007_v19  ;;  %v563_v27 = vor.u32 %v562_v17, %v558_v9  ;;  %v565_v29 = vshll.u32 %v3925_v25, 16  ;;  %v3927_v30 = vld [vmem:[%s4233_s19 + $0x8] ss:$0 sps:$4 sm:$0x11]   ;;  %v3928_v36 = vld [vmem:[%s4233_s19 + $0x6c] sm:$0xff]   ;;  %v642_v47 = vshrl.u32 %v3930_v38, 16 }
  0x1a   : > { %v984_v28 = vsel %vm978_vm0, %v982_v23, %v983_v24  ;;  %v550_v34 = vrot.slane %v548_v32, 1  ;;  %v553_v35 = vshll.u32 %v3927_v30, 16  ;;  %v3929_v37 = vld [vmem:[%s4233_s19 + $0x74] ss:$0 sps:$4 sm:$0x11]   ;;  %v654_v42 = vshrl.u32 %v3928_v36, 16 }
  0x1b   : > { %1045 = vrot.lane.b32.xlu1 %v1008_v22, %s4182_s21  ;;  %v567_v33 = vrot.slane %v565_v29, 1  ;;  %v656_v43 = vshll.u32 %v3928_v36, 16  ;;  %v661_v44 = vshll.u32 %v3929_v37, 16  ;;  %v3931_v45 = vld [vmem:[%s4233_s19 + $0x68] ss:$0 sps:$4 sm:$0x11]  }
  0x1c   : > { %1029 = vrot.lane.b32.xlu0 %v984_v28, %s4182_s21  ;;  %v551_v40 = vor.u32 %v550_v34, %v546_v31  ;;  %v555_v41 = vrot.slane %v553_v35, 1  ;;  %v644_v48 = vshll.u32 %v3930_v38, 16  ;;  %v649_v51 = vshll.u32 %v3931_v45, 16  ;;  %v3934_v53 = vld [vmem:[%s4233_s19 + $0x6c] sm:$0xff]   ;;  %v3933_v62 = vld [vmem:[%s4233_s19 + $0x18] sm:$0xff]  }
  0x1d   : > { %v568_v39 = vsel %vm544_vm1, %v563_v27, %v567_v33  ;;  %v658_v49 = vrot.slane %v656_v43, 1  ;;  %v663_v50 = vrot.slane %v661_v44, 1  ;;  %v3935_v56 = vld [vmem:[%s4233_s19 + $0x74] ss:$0 sps:$4 sm:$0x11]   ;;  %v1543_v59 = vshrl.u32 %v3934_v53, 16 }
  0x1e   : > { %v556_v46 = vsel %vm544_vm1, %v551_v40, %v555_v41  ;;  %v646_v52 = vrot.slane %v644_v48, 1  ;;  %v651_v55 = vrot.slane %v649_v51, 1  ;;  %v1545_v60 = vshll.u32 %v3934_v53, 16  ;;  %v3936_v0 = vld [vmem:[%s4233_s19 + $0xc] sm:$0xff]   ;;  %v3938_v7 = vld [vmem:[%s4233_s19 + $0x78] sm:$0xff]  }
  0x1f   : > { %739 = vrot.lane.b32.xlu1 %v568_v39, %s4183_s22  ;;  %v659_v54 = vor.u32 %v658_v49, %v654_v42  ;;  %v1550_v63 = vshll.u32 %v3935_v56, 16  ;;  %v3937_v3 = vld [vmem:[%s4233_s19 + $0x14] ss:$0 sps:$4 sm:$0x11]   ;;  %v1447_v5 = vshrl.u32 %v3936_v0, 16  ;;  %v1449_v6 = vshll.u32 %v3936_v0, 16 }
  0x20   : > { %737 = vrot.lane.b32.xlu0 %v556_v46, %s4183_s22  ;;  %v647_v57 = vor.u32 %v646_v52, %v642_v47  ;;  %v1547_v2 = vrot.slane %v1545_v60, 1  ;;  %v1454_v9 = vshll.u32 %v3937_v3, 16  ;;  %v3939_v10 = vld [vmem:[%s4233_s19 + $0x80] ss:$0 sps:$4 sm:$0x11]   ;;  %v1555_v12 = vshrl.u32 %v3938_v7, 16 }
  0x21   : > { %v664_v61 = vsel %vm544_vm1, %v659_v54, %v663_v50  ;;  %v1552_v4 = vrot.slane %v1550_v63, 1  ;;  %v1451_v11 = vrot.slane %v1449_v6, 1  ;;  %v1557_v13 = vshll.u32 %v3938_v7, 16  ;;  %v3940_v14 = vld [vmem:[%s4233_s19 + $0x18] sm:$0xff]   ;;  %v3942_v28 = vld [vmem:[%s4233_s19 + $0x6c] sm:$0xfe]  }
  0x22   : > { %v652_v1 = vsel %vm544_vm1, %v647_v57, %v651_v55  ;;  %v1548_v8 = vor.u32 %v1547_v2, %v1543_v59  ;;  %v1456_v16 = vrot.slane %v1454_v9, 1  ;;  %v1562_v17 = vshll.u32 %v3939_v10, 16  ;;  %v3941_v20 = vld [vmem:[%s4233_s19 + $0x20] ss:$0 sps:$4 sm:$0x11]   ;;  %v3954_v49 = vld [vmem:[%s4233_s19 + $0x78] sm:$0xff]  }
  0x23   : > { %755 = vrot.lane.b32.xlu1 %v664_v61, %s4183_s22  ;;  %v1452_v18 = vor.u32 %v1451_v11, %v1447_v5  ;;  %v1559_v19 = vrot.slane %v1557_v13, 1  ;;  %v1459_v21 = vshrl.u32 %v3940_v14, 16  ;;  %v1461_v22 = vshll.u32 %v3940_v14, 16  ;;  %v3943_v29 = vld [vmem:[%s4233_s19 + $0x74] ss:$0 sps:$4 sm:$0x11]  }
  0x24   : > { %753 = vrot.lane.b32.xlu0 %v652_v1, %s4183_s22  ;;  %v1553_v15 = vsel %vm544_vm1, %v1548_v8, %v1552_v4  ;;  %v1564_v23 = vrot.slane %v1562_v17, 1  ;;  %v1466_v27 = vshll.u32 %v3941_v20, 16  ;;  %v1903_v33 = vrot.slane %v3942_v28, 1  ;;  %v3944_v34 = vld [vmem:[%s4233_s19 + $0xc] sm:$0xfe]   ;;  %v3956_v52 = vld [vmem:[%s4233_s19 + $0x18] sm:$0xff]  }
  0x25   : > { %v1457_v24 = vsel %vm544_vm1, %v1452_v18, %v1456_v16  ;;  %v1560_v25 = vor.u32 %v1559_v19, %v1555_v12  ;;  %v1463_v26 = vrot.slane %v1461_v22, 1  ;;  %v1904_v35 = vrot.slane %v3943_v29, 1  ;;  %v3945_v36 = vld [vmem:[%s4233_s19 + $0x14] ss:$0 sps:$4 sm:$0x11]   ;;  %v3950_v53 = vld [vmem:[%s4233_s19 + $0x78] sm:$0xff]  }
  0x26   : > { %v1468_v32 = vrot.slane %v1466_v27, 1  ;;  %v1879_v38 = vrot.slane %v3944_v34, 1  ;;  %v1880_v39 = vrot.slane %v3945_v36, 1  ;;  %v3946_v40 = vld [vmem:[%s4233_s19 + $0x78] sm:$0xfe]   ;;  %v2443_v56 = vshrl.u32 %v3954_v49, 16 }
  0x27   : > { %1223 = vrot.lane.b32.xlu1 %v3932_v58, %s4181_s20  ;;  %v1565_v30 = vsel %vm544_vm1, %v1560_v25, %v1564_v23  ;;  %v1464_v31 = vor.u32 %v1463_v26, %v1459_v21  ;;  %v3947_v41 = vld [vmem:[%s4233_s19 + $0x80] ss:$0 sps:$4 sm:$0x11]   ;;  %v1905_v42 = vsel %vm978_vm0, %v1903_v33, %v1904_v35  ;;  %v1906_v44 = vrot.slane %v3946_v40, 1  ;;  %v3948_v46 = vld [vmem:[%s4233_s19 + $0x18] sm:$0xfe]  }
  0x28   : > { %1207 = vrot.lane.b32.xlu0 %v3933_v62, %s4181_s20  ;;  %v1881_v43 = vsel %vm978_vm0, %v1879_v38, %v1880_v39  ;;  %v1907_v45 = vrot.slane %v3947_v41, 1  ;;  %v3949_v47 = vld [vmem:[%s4233_s19 + $0x20] ss:$0 sps:$4 sm:$0x11]   ;;  %v1882_v48 = vrot.slane %v3948_v46, 1  ;;  %v3951_v55 = vld [vmem:[%s4233_s19 + $0x18] sm:$0xff]  }
  0x29   : > { %v1469_v37 = vsel %vm544_vm1, %v1464_v31, %v1468_v32  ;;  %v1883_v51 = vrot.slane %v3949_v47, 1  ;;  %v2445_v57 = vshll.u32 %v3954_v49, 16  ;;  %v3955_v58 = vld [vmem:[%s4233_s19 + $0x80] ss:$0 sps:$4 sm:$0x11]   ;;  %v2347_v59 = vshrl.u32 %v3956_v52, 16 }
  0x2a   : > { %v1908_v50 = vsel %vm978_vm0, %v1906_v44, %v1907_v45  ;;  %v2349_v61 = vshll.u32 %v3956_v52, 16  ;;  %v3952_v62 = vld [vmem:[%s4233_s19 + $0x84] sm:$0xff]   ;;  %v2450_v63 = vshll.u32 %v3955_v58, 16  ;;  %v3957_v0 = vld [vmem:[%s4233_s19 + $0x20] ss:$0 sps:$4 sm:$0x11]  }
  0x2b   : > { %1654 = vrot.lane.b32.xlu1 %v1553_v15, %s4184_s23  ;;  %v1884_v54 = vsel %vm978_vm0, %v1882_v48, %v1883_v51  ;;  %v2447_v60 = vrot.slane %v2445_v57, 1  ;;  %v3953_v1 = vld [vmem:[%s4233_s19 + $0x24] sm:$0xff]   ;;  %v2354_v5 = vshll.u32 %v3957_v0, 16  ;;  %v3959_v6 = vld [vmem:[%s4233_s19 + $0x8c] ss:$0 sps:$4 sm:$0x11]  }
  0x2c   : > { %1638 = vrot.lane.b32.xlu0 %v1457_v24, %s4184_s23  ;;  %v2351_v2 = vrot.slane %v2349_v61, 1  ;;  %v3958_v3 = vld [vmem:[%s4233_s19 + $0x84] sm:$0xff]   ;;  %v2452_v4 = vrot.slane %v2450_v63, 1  ;;  %v2462_v13 = vshll.u32 %v3959_v6, 16  ;;  %v3966_v14 = vld [vmem:[%s4233_s19 + $0x78] sm:$0xff]  }
  0x2d   : > { %v3960_v7 = vld [vmem:[%s4233_s19 + $0x24] sm:$0xff]   ;;  %v2448_v8 = vor.u32 %v2447_v60, %v2443_v56  ;;  %v2455_v9 = vshrl.u32 %v3958_v3, 16  ;;  %v2457_v10 = vshll.u32 %v3958_v3, 16  ;;  %v2356_v12 = vrot.slane %v2354_v5, 1  ;;  %v3962_v25 = vld [vmem:[%s4233_s19 + $0x78] sm:$0xfe]  }
  0x2e   : > { %v2352_v11 = vor.u32 %v2351_v2, %v2347_v59  ;;  %v3961_v16 = vld [vmem:[%s4233_s19 + $0x2c] ss:$0 sps:$4 sm:$0x11]   ;;  %v2359_v17 = vshrl.u32 %v3960_v7, 16  ;;  %v2361_v18 = vshll.u32 %v3960_v7, 16  ;;  %v2464_v19 = vrot.slane %v2462_v13, 1 }
  0x2f   : > { %1656 = vrot.lane.b32.xlu1 %v1565_v30, %s4184_s23  ;;  %v2459_v15 = vrot.slane %v2457_v10, 1  ;;  %v666_v20 = vshrl.u32 %v3966_v14, 16  ;;  %v2453_v21 = vsel %vm544_vm1, %v2448_v8, %v2452_v4  ;;  %v2366_v24 = vshll.u32 %v3961_v16, 16  ;;  %v3963_v27 = vld [vmem:[%s4233_s19 + $0x80] ss:$0 sps:$4 sm:$0x11]  }
  0x30   : > { %1640 = vrot.lane.b32.xlu0 %v1469_v37, %s4184_s23  ;;  %v2363_v23 = vrot.slane %v2361_v18, 1  ;;  %v2357_v26 = vsel %vm544_vm1, %v2352_v11, %v2356_v12  ;;  %v668_v28 = vshll.u32 %v3966_v14, 16  ;;  %v2803_v31 = vrot.slane %v3962_v25, 1  ;;  %v3968_v32 = vld [vmem:[%s4233_s19 + $0x18] sm:$0xff]   ;;  %v3970_v51 = vld [vmem:[%s4233_s19 + $0x84] sm:$0xfe]  }
  0x31   : > { %v2460_v22 = vor.u32 %v2459_v15, %v2455_v9  ;;  %v2368_v30 = vrot.slane %v2366_v24, 1  ;;  %v2804_v33 = vrot.slane %v3963_v27, 1  ;;  %v3964_v34 = vld [vmem:[%s4233_s19 + $0x18] sm:$0xfe]   ;;  %v570_v46 = vshrl.u32 %v3968_v32, 16  ;;  %v3974_v52 = vld [vmem:[%s4233_s19 + $0x84] sm:$0xff]  }
  0x32   : > { %v2364_v29 = vor.u32 %v2363_v23, %v2359_v17  ;;  %v3965_v35 = vld [vmem:[%s4233_s19 + $0x20] ss:$0 sps:$4 sm:$0x11]   ;;  %v2779_v38 = vrot.slane %v3964_v34, 1  ;;  %v670_v41 = vrot.slane %v668_v28, 1  ;;  %v572_v47 = vshll.u32 %v3968_v32, 16 }
  0x33   : > { %1943 = vrot.lane.b32.xlu1 %v1905_v42, %s4185_s24  ;;  %v2465_v36 = vsel %vm544_vm1, %v2460_v22, %v2464_v19  ;;  %v2780_v39 = vrot.slane %v3965_v35, 1  ;;  %v3967_v40 = vld [vmem:[%s4233_s19 + $0x80] ss:$0 sps:$4 sm:$0x11]   ;;  %v2805_v44 = vsel %vm978_vm0, %v2803_v31, %v2804_v33  ;;  %v2806_v56 = vrot.slane %v3970_v51, 1  ;;  %v3976_v57 = vld [vmem:[%s4233_s19 + $0x24] sm:$0xff]  }
  0x34   : > { %1927 = vrot.lane.b32.xlu0 %v1881_v43, %s4185_s24  ;;  %v2369_v37 = vsel %vm544_vm1, %v2364_v29, %v2368_v30  ;;  %v673_v42 = vshll.u32 %v3967_v40, 16  ;;  %v3969_v43 = vld [vmem:[%s4233_s19 + $0x20] ss:$0 sps:$4 sm:$0x11]   ;;  %v671_v45 = vor.u32 %v670_v41, %v666_v20  ;;  %v3972_v61 = vld [vmem:[%s4233_s19 + $0x24] sm:$0xfe]  }
  0x35   : > { %v2781_v48 = vsel %vm978_vm0, %v2779_v38, %v2780_v39  ;;  %v2782_v0 = vrot.slane %v3972_v61, 1  ;;  %v3975_v2 = vld [vmem:[%s4233_s19 + $0x8c] ss:$0 sps:$4 sm:$0x11]   ;;  %v678_v3 = vshrl.u32 %v3974_v52, 16  ;;  %v680_v4 = vshll.u32 %v3974_v52, 16 }
  0x36   : > { %v675_v49 = vrot.slane %v673_v42, 1  ;;  %v685_v6 = vshll.u32 %v3975_v2, 16  ;;  %v3977_v7 = vld [vmem:[%s4233_s19 + $0x2c] ss:$0 sps:$4 sm:$0x11]   ;;  %v582_v10 = vshrl.u32 %v3976_v57, 16 }
  0x37   : > { %1945 = vrot.lane.b32.xlu1 %v1908_v50, %s4185_s24  ;;  %v577_v50 = vshll.u32 %v3969_v43, 16  ;;  %v682_v9 = vrot.slane %v680_v4, 1  ;;  %v584_v11 = vshll.u32 %v3976_v57, 16  ;;  %v589_v13 = vshll.u32 %v3977_v7, 16  ;;  %v3978_v16 = vld [vmem:[%s4233_s19 + $0x78] sm:$0xfe]  }
  0x38   : > { %1929 = vrot.lane.b32.xlu0 %v1884_v54, %s4185_s24  ;;  %v3971_v54 = vld [vmem:[%s4233_s19 + $0x8c] ss:$0 sps:$4 sm:$0x11]   ;;  %v676_v58 = vsel %vm544_vm1, %v671_v45, %v675_v49  ;;  %v687_v12 = vrot.slane %v685_v6, 1  ;;  %v3980_v23 = vld [vmem:[%s4233_s19 + $0x18] sm:$0xfe]  }
  0x39   : > { %v2807_v60 = vrot.slane %v3971_v54, 1  ;;  %v683_v14 = vor.u32 %v682_v9, %v678_v3  ;;  %v586_v15 = vrot.slane %v584_v11, 1  ;;  %v3979_v17 = vld [vmem:[%s4233_s19 + $0x80] ss:$0 sps:$4 sm:$0x11]   ;;  %v591_v18 = vrot.slane %v589_v13, 1 }
  0x3a   : > { %v1010_v22 = vrot.slane %v3979_v17, 1  ;;  %v3981_v24 = vld [vmem:[%s4233_s19 + $0x20] ss:$0 sps:$4 sm:$0x11]   ;;  %v3990_v27 = vld [vmem:[%s4233_s19 + $0x84] sm:$0xff]   ;;  %v3989_v51 = vld [vmem:[%s4233_s19 + $0x30] sm:$0xff]  }
  0x3b   : > { %2121 = vrot.lane.b32.xlu1 %v3950_v53, %s4186_s25  ;;  %v574_v53 = vrot.slane %v572_v47, 1  ;;  %v2808_v5 = vsel %vm978_vm0, %v2806_v56, %v2807_v60  ;;  %v688_v19 = vsel %vm544_vm1, %v683_v14, %v687_v12  ;;  %v587_v20 = vor.u32 %v586_v15, %v582_v10  ;;  %v3982_v30 = vld [vmem:[%s4233_s19 + $0x84] sm:$0xfe]   ;;  %v3983_v31 = vld [vmem:[%s4233_s19 + $0x8c] ss:$0 sps:$4 sm:$0x11]  }
  0x3c   : > { %2105 = vrot.lane.b32.xlu0 %v3951_v55, %s4186_s25  ;;  %v579_v55 = vrot.slane %v577_v50, 1  ;;  %v986_v29 = vrot.slane %v3981_v24, 1  ;;  %v1012_v33 = vrot.slane %v3982_v30, 1  ;;  %v1013_v34 = vrot.slane %v3983_v31, 1  ;;  %v3984_v35 = vld [vmem:[%s4233_s19 + $0x24] sm:$0xfe]  }
  0x3d   : > { %v575_v59 = vor.u32 %v574_v53, %v570_v46  ;;  %v592_v25 = vsel %vm544_vm1, %v587_v20, %v591_v18  ;;  %v988_v39 = vrot.slane %v3984_v35, 1  ;;  %v1569_v40 = vshll.u32 %v3990_v27, 16  ;;  %v3986_v42 = vld [vmem:[%s4233_s19 + $0x84] sm:$0xff]   ;;  %v3988_v50 = vld [vmem:[%s4233_s19 + $0x90] sm:$0xff]  }
  0x3e   : > { %v1014_v38 = vsel %vm978_vm0, %v1012_v33, %v1013_v34  ;;  %v3992_v43 = vld [vmem:[%s4233_s19 + $0x24] sm:$0xff]   ;;  %v3993_v53 = vld [vmem:[%s4233_s19 + $0x2c] ss:$0 sps:$4 sm:$0x11]   ;;  %v4004_v30 = vld [vmem:[%s4233_s19 + $0x30] sm:$0xfe]  }
  0x3f   : > { %2123 = vrot.lane.b32.xlu1 %v3952_v62, %s4186_s25  ;;  %v3973_v62 = vld [vmem:[%s4233_s19 + $0x2c] ss:$0 sps:$4 sm:$0x11]   ;;  %v580_v63 = vsel %vm544_vm1, %v575_v59, %v579_v55  ;;  %v1571_v46 = vrot.slane %v1569_v40, 1  ;;  %v1471_v47 = vshrl.u32 %v3992_v43, 16  ;;  %v1473_v49 = vshll.u32 %v3992_v43, 16 }
  0x40   : > { %2107 = vrot.lane.b32.xlu0 %v3953_v1, %s4186_s25  ;;  %v2783_v1 = vrot.slane %v3973_v62, 1  ;;  %v3994_v55 = vld [vmem:[%s4233_s19 + $0x90] sm:$0xff]   ;;  %v3995_v59 = vld [vmem:[%s4233_s19 + $0x98] ss:$0 sps:$4 sm:$0x11]   ;;  %v1888_v34 = vrot.slane %v4004_v30, 1 }
  0x41   : > { %v1475_v54 = vrot.slane %v1473_v49, 1  ;;  %v1579_v60 = vshrl.u32 %v3994_v55, 16  ;;  %v1581_v62 = vshll.u32 %v3994_v55, 16  ;;  %v3997_v2 = vld [vmem:[%s4233_s19 + $0x38] ss:$0 sps:$4 sm:$0x11]  }
  0x42   : > { %v2784_v8 = vsel %vm978_vm0, %v2782_v0, %v2783_v1  ;;  %v1586_v1 = vshll.u32 %v3995_v59, 16  ;;  %v3998_v12 = vld [vmem:[%s4233_s19 + $0x84] sm:$0xfe]   ;;  %v3999_v13 = vld [vmem:[%s4233_s19 + $0x8c] ss:$0 sps:$4 sm:$0x11]  }
  0x43   : > { %2554 = vrot.lane.b32.xlu1 %v2453_v21, %s4187_s26  ;;  %v1009_v21 = vrot.slane %v3978_v16, 1  ;;  %v1476_v61 = vor.u32 %v1475_v54, %v1471_v47  ;;  %v1583_v3 = vrot.slane %v1581_v62, 1  ;;  %v1909_v16 = vrot.slane %v3998_v12, 1  ;;  %v4000_v17 = vld [vmem:[%s4233_s19 + $0x24] sm:$0xfe]   ;;  %v4006_v40 = vld [vmem:[%s4233_s19 + $0x90] sm:$0xff]  }
  0x44   : > { %2538 = vrot.lane.b32.xlu0 %v2357_v26, %s4187_s26  ;;  %v985_v26 = vrot.slane %v3980_v23, 1  ;;  %v1588_v7 = vrot.slane %v1586_v1, 1  ;;  %v4001_v20 = vld [vmem:[%s4233_s19 + $0x2c] ss:$0 sps:$4 sm:$0x11]   ;;  %v4010_v23 = vld [vmem:[%s4233_s19 + $0x90] sm:$0xff]  }
  0x45   : > { %v1011_v28 = vsel %vm978_vm0, %v1009_v21, %v1010_v22  ;;  %v1584_v10 = vor.u32 %v1583_v3, %v1579_v60  ;;  %v1885_v22 = vrot.slane %v4000_v17, 1  ;;  %v1886_v24 = vrot.slane %v4001_v20, 1  ;;  %v4007_v43 = vld [vmem:[%s4233_s19 + $0x30] sm:$0xff]   ;;  %v4013_v47 = vld [vmem:[%s4233_s19 + $0x38] ss:$0 sps:$4 sm:$0x11]  }
  0x46   : > { %v987_v32 = vsel %vm978_vm0, %v985_v26, %v986_v29  ;;  %v4003_v26 = vld [vmem:[%s4233_s19 + $0x98] ss:$0 sps:$4 sm:$0x11]   ;;  %v2467_v33 = vshrl.u32 %v4010_v23, 16  ;;  %v2469_v35 = vshll.u32 %v4010_v23, 16  ;;  %v4014_v49 = vld [vmem:[%s4233_s19 + $0x9c] sm:$0xff]  }
  0x47   : > { %2556 = vrot.lane.b32.xlu1 %v2465_v36, %s4187_s26  ;;  %v3985_v36 = vld [vmem:[%s4233_s19 + $0x2c] ss:$0 sps:$4 sm:$0x11]   ;;  %v1589_v18 = vsel %vm544_vm1, %v1584_v10, %v1588_v7  ;;  %v1913_v29 = vrot.slane %v4003_v26, 1  ;;  %v1887_v31 = vsel %vm978_vm0, %v1885_v22, %v1886_v24  ;;  %v2481_v55 = vshll.u32 %v4014_v49, 16  ;;  %v4022_v3 = vld [vmem:[%s4233_s19 + $0x90] sm:$0xff]  }
  0x48   : > { %2540 = vrot.lane.b32.xlu0 %v2369_v37, %s4187_s26  ;;  %v1567_v37 = vshrl.u32 %v3990_v27, 16  ;;  %v989_v41 = vrot.slane %v3985_v36, 1  ;;  %v4015_v54 = vld [vmem:[%s4233_s19 + $0xa4] ss:$0 sps:$4 sm:$0x11]   ;;  %v2479_v59 = vshrl.u32 %v4014_v49, 16 }
  0x49   : > { %v2486_v60 = vshll.u32 %v4015_v54, 16  ;;  %v4021_v20 = vld [vmem:[%s4233_s19 + $0x38] ss:$0 sps:$4 sm:$0x11]   ;;  %v4033_v49 = vld [vmem:[%s4233_s19 + $0x60] sm:$0xff]  }
  0x4a   : > { %v990_v45 = vsel %vm978_vm0, %v988_v39, %v989_v41  ;;  %v1572_v56 = vor.u32 %v1571_v46, %v1567_v37  ;;  %v4012_v37 = vld [vmem:[%s4233_s19 + $0x30] sm:$0xff]   ;;  %v2471_v41 = vrot.slane %v2469_v35, 1  ;;  %v2786_v26 = vrot.slane %v4021_v20, 1  ;;  %360 = vst.msk [vmem:[#allocation2 + $0x40] sm:$0xff] %vm351_vm2, %v4033_v49  ;;  %v4052_v49 = vld [vmem:[%s4233_s19 + $0x3c] sm:$0xff]  }
  0x4b   : > { %2843 = vrot.lane.b32.xlu1 %v2805_v44, %s4188_s27  ;;  %v3987_v44 = vld [vmem:[%s4233_s19 + $0x24] sm:$0xff]   ;;  %v4026_v35 = vld [vmem:[%s4233_s19 + $0xc] sm:$0xff]  }
  0x4c   : > { %2827 = vrot.lane.b32.xlu0 %v2781_v48, %s4188_s27  ;;  %v3991_v48 = vld [vmem:[%s4233_s19 + $0x8c] ss:$0 sps:$4 sm:$0x11]   ;;  %353 = vst.msk [vmem:[#allocation2 + $0x8] sm:$0xff] %vm351_vm2, %v4026_v35 }
  0x4d   : > { %v1574_v52 = vshll.u32 %v3991_v48, 16 }
  0x4f   : > { %757 = vrot.lane.b32.xlu1 %v676_v58, %s4183_s22  ;;  %v1576_v57 = vrot.slane %v1574_v52, 1  ;;  %v1478_v58 = vshll.u32 %v3993_v53, 16  ;;  %v2378_v53 = vshll.u32 %v4013_v47, 16  ;;  %v4032_v47 = vld [vmem:[%s4233_s19 + $0x6c] sm:$0xff]  }
  0x50   : > { %741 = vrot.lane.b32.xlu0 %v580_v63, %s4183_s22  ;;  %v3996_v63 = vld [vmem:[%s4233_s19 + $0x30] sm:$0xff]   ;;  %361 = vst.msk [vmem:[#allocation2 + $0x48] sm:$0xff] %vm351_vm2, %v4032_v47  ;;  %v4050_v47 = vld [vmem:[%s4233_s19 + $0x9c] sm:$0xff]  }
  0x51   : > { %v1480_v0 = vrot.slane %v1478_v58, 1  ;;  %v1483_v4 = vshrl.u32 %v3996_v63, 16  ;;  %v1577_v6 = vsel %vm544_vm1, %v1572_v56, %v1576_v57  ;;  %v4016_v56 = vld [vmem:[%s4233_s19 + $0x3c] sm:$0xff]   ;;  %v2472_v57 = vor.u32 %v2471_v41, %v2467_v33  ;;  %v4025_v33 = vld [vmem:[%s4233_s19 + $0x38] ss:$0 sps:$4 sm:$0x11]  }
  0x52   : > { %v2380_v58 = vrot.slane %v2378_v53, 1  ;;  %v2383_v1 = vshrl.u32 %v4016_v56, 16  ;;  %v4027_v41 = vld [vmem:[%s4233_s19] sm:$0xff]  }
  0x53   : > { %2845 = vrot.lane.b32.xlu1 %v2808_v5, %s4188_s27  ;;  %v1485_v5 = vshll.u32 %v3996_v63, 16  ;;  %v1481_v9 = vsel %vm544_vm1, %v1476_v61, %v1480_v0  ;;  %v4017_v61 = vld [vmem:[%s4233_s19 + $0x44] ss:$0 sps:$4 sm:$0x11]   ;;  %v2483_v0 = vrot.slane %v2481_v55, 1  ;;  %352 = vst.msk [vmem:[#allocation2] sm:$0xff] %vm351_vm2, %v4027_v41 }
  0x54   : > { %2829 = vrot.lane.b32.xlu0 %v2784_v8, %s4188_s27  ;;  %v1490_v8 = vshll.u32 %v3997_v2, 16  ;;  %v2385_v2 = vshll.u32 %v4016_v56, 16  ;;  %v4030_v55 = vld [vmem:[%s4233_s19 + $0x3c] sm:$0xfe]  }
  0x55   : > { %v1487_v11 = vrot.slane %v1485_v5, 1  ;;  %v2390_v5 = vshll.u32 %v4017_v61, 16  ;;  %v2484_v12 = vor.u32 %v2483_v0, %v2479_v59  ;;  %v4031_v56 = vld [vmem:[%s4233_s19 + $0x44] ss:$0 sps:$4 sm:$0x11]  }
  0x56   : > { %v1492_v14 = vrot.slane %v1490_v8, 1  ;;  %v2387_v7 = vrot.slane %v2385_v2, 1  ;;  %v4018_v8 = vld [vmem:[%s4233_s19 + $0x90] sm:$0xfe]   ;;  %v2789_v59 = vrot.slane %v4031_v56, 1  ;;  %v1495_v56 = vshrl.u32 %v4052_v49, 16 }
  0x57   : > { %759 = vrot.lane.b32.xlu1 %v688_v19, %s4183_s22  ;;  %v1488_v15 = vor.u32 %v1487_v11, %v1483_v4  ;;  %v1910_v19 = vrot.slane %v3999_v13, 1  ;;  %v2488_v4 = vrot.slane %v2486_v60, 1  ;;  %v2392_v13 = vrot.slane %v2390_v5, 1  ;;  %v4035_v2 = vld [vmem:[%s4233_s19 + $0xa4] ss:$0 sps:$4 sm:$0x11]  }
  0x58   : > { %743 = vrot.lane.b32.xlu0 %v592_v25, %s4183_s22  ;;  %v4002_v25 = vld [vmem:[%s4233_s19 + $0x90] sm:$0xfe]   ;;  %v2809_v17 = vrot.slane %v4018_v8, 1  ;;  %v709_v5 = vshll.u32 %v4035_v2, 16 }
  0x59   : > { %v1493_v21 = vsel %vm544_vm1, %v1488_v15, %v1492_v14  ;;  %v1911_v27 = vsel %vm978_vm0, %v1909_v16, %v1910_v19  ;;  %v690_v14 = vshrl.u32 %v4022_v3, 16  ;;  %v2388_v16 = vor.u32 %v2387_v7, %v2383_v1  ;;  %v4020_v19 = vld [vmem:[%s4233_s19 + $0x30] sm:$0xfe]  }
  0x5a   : > { %v2785_v23 = vrot.slane %v4020_v19, 1 }
  0x5b   : > { %1047 = vrot.lane.b32.xlu1 %v1011_v28, %s4182_s21  ;;  %v1912_v28 = vrot.slane %v4002_v25, 1  ;;  %v2489_v25 = vsel %vm544_vm1, %v2484_v12, %v2488_v4  ;;  %v2393_v30 = vsel %vm544_vm1, %v2388_v16, %v2392_v13  ;;  %v711_v12 = vrot.slane %v709_v5, 1 }
  0x5c   : > { %1031 = vrot.lane.b32.xlu0 %v987_v32, %s4182_s21  ;;  %v4005_v32 = vld [vmem:[%s4233_s19 + $0x38] ss:$0 sps:$4 sm:$0x11]  }
  0x5d   : > { %v1889_v36 = vrot.slane %v4005_v32, 1 }
  0x5f   : > { %1049 = vrot.lane.b32.xlu1 %v1014_v38, %s4182_s21  ;;  %v1914_v38 = vsel %vm978_vm0, %v1912_v28, %v1913_v29  ;;  %v1890_v39 = vsel %vm978_vm0, %v1888_v34, %v1889_v36 }
  0x60   : > { %1033 = vrot.lane.b32.xlu0 %v990_v45, %s4182_s21  ;;  %v2373_v45 = vshll.u32 %v4012_v37, 16 }
  0x62   : > { %v2375_v48 = vrot.slane %v2373_v45, 1 }
  0x63   : > { %1225 = vrot.lane.b32.xlu1 %v3986_v42, %s4181_s20  ;;  %v2371_v42 = vshrl.u32 %v4012_v37, 16 }
  0x64   : > { %1209 = vrot.lane.b32.xlu0 %v3987_v44, %s4181_s20  ;;  %v4011_v44 = vld [vmem:[%s4233_s19 + $0x98] ss:$0 sps:$4 sm:$0x11]  }
  0x65   : > { %v2474_v46 = vshll.u32 %v4011_v44, 16  ;;  %v2376_v62 = vor.u32 %v2375_v48, %v2371_v42  ;;  %v2787_v42 = vsel %vm978_vm0, %v2785_v23, %v2786_v26  ;;  %v4029_v48 = vld [vmem:[%s4233_s19 + $0xa4] ss:$0 sps:$4 sm:$0x11]   ;;  %v4040_v23 = vld [vmem:[%s4233_s19 + $0x30] sm:$0xfe]  }
  0x66   : > { %v2813_v54 = vrot.slane %v4029_v48, 1  ;;  %v4051_v48 = vld [vmem:[%s4233_s19 + $0xa4] ss:$0 sps:$4 sm:$0x11]  }
  0x67   : > { %1227 = vrot.lane.b32.xlu1 %v3988_v50, %s4181_s20  ;;  %v4008_v50 = vld [vmem:[%s4233_s19 + $0x9c] sm:$0xff]   ;;  %v2476_v52 = vrot.slane %v2474_v46, 1  ;;  %v2381_v15 = vsel %vm544_vm1, %v2376_v62, %v2380_v58  ;;  %v2788_v58 = vrot.slane %v4030_v55, 1 }
  0x68   : > { %1211 = vrot.lane.b32.xlu0 %v3989_v51, %s4181_s20  ;;  %v4009_v51 = vld [vmem:[%s4233_s19 + $0x3c] sm:$0xff]  }
  0x69   : > { %v2477_v10 = vsel %vm544_vm1, %v2472_v57, %v2476_v52  ;;  %v4028_v46 = vld [vmem:[%s4233_s19 + $0x9c] sm:$0xfe]   ;;  %v2790_v1 = vsel %vm978_vm0, %v2788_v58, %v2789_v59 }
  0x6a   : > { %v4034_v52 = vld [vmem:[%s4233_s19 + $0x9c] sm:$0xff]  }
  0x6b   : > { %1658 = vrot.lane.b32.xlu1 %v1577_v6, %s4184_s23  ;;  %v4024_v6 = vld [vmem:[%s4233_s19 + $0x30] sm:$0xff]   ;;  %v702_v62 = vshrl.u32 %v4034_v52, 16  ;;  %v704_v0 = vshll.u32 %v4034_v52, 16  ;;  %v1593_v52 = vshll.u32 %v4050_v47, 16 }
  0x6c   : > { %1642 = vrot.lane.b32.xlu0 %v1481_v9, %s4184_s23  ;;  %v4019_v9 = vld [vmem:[%s4233_s19 + $0x98] ss:$0 sps:$4 sm:$0x11]   ;;  %v594_v24 = vshrl.u32 %v4024_v6, 16  ;;  %v596_v29 = vshll.u32 %v4024_v6, 16 }
  0x6d   : > { %v706_v4 = vrot.slane %v704_v0, 1  ;;  %v4037_v6 = vld [vmem:[%s4233_s19 + $0x44] ss:$0 sps:$4 sm:$0x11]   ;;  %v1595_v59 = vrot.slane %v1593_v52, 1  ;;  %v4067_v52 = vld [vmem:[%s4233_s19 + $0x48] sm:$0xff]  }
  0x6e   : > { %v598_v34 = vrot.slane %v596_v29, 1 }
  0x6f   : > { %1660 = vrot.lane.b32.xlu1 %v1589_v18, %s4184_s23  ;;  %v2810_v18 = vrot.slane %v4019_v9, 1  ;;  %v707_v9 = vor.u32 %v706_v4, %v702_v62  ;;  %v4054_v62 = vld [vmem:[%s4233_s19 + $0xa8] sm:$0xff]  }
  0x70   : > { %1644 = vrot.lane.b32.xlu0 %v1493_v21, %s4184_s23  ;;  %v692_v21 = vshll.u32 %v4022_v3, 16  ;;  %v4036_v3 = vld [vmem:[%s4233_s19 + $0x3c] sm:$0xff]   ;;  %v1603_v4 = vshrl.u32 %v4054_v62, 16  ;;  %v1605_v5 = vshll.u32 %v4054_v62, 16 }
  0x71   : > { %v2811_v36 = vsel %vm978_vm0, %v2809_v17, %v2810_v18  ;;  %v606_v7 = vshrl.u32 %v4036_v3, 16  ;;  %v608_v8 = vshll.u32 %v4036_v3, 16  ;;  %v4039_v17 = vld [vmem:[%s4233_s19 + $0x98] ss:$0 sps:$4 sm:$0x11]  }
  0x72   : > { %v694_v28 = vrot.slane %v692_v21, 1  ;;  %v1016_v21 = vrot.slane %v4039_v17, 1 }
  0x73   : > { %1947 = vrot.lane.b32.xlu1 %v1911_v27, %s4185_s24  ;;  %v4023_v27 = vld [vmem:[%s4233_s19 + $0x98] ss:$0 sps:$4 sm:$0x11]   ;;  %v610_v13 = vrot.slane %v608_v8, 1 }
  0x74   : > { %1931 = vrot.lane.b32.xlu0 %v1887_v31, %s4185_s24  ;;  %v697_v32 = vshll.u32 %v4023_v27, 16 }
  0x75   : > { %v611_v18 = vor.u32 %v610_v13, %v606_v7 }
  0x77   : > { %1949 = vrot.lane.b32.xlu1 %v1914_v38, %s4185_s24  ;;  %v695_v38 = vor.u32 %v694_v28, %v690_v14  ;;  %v613_v14 = vshll.u32 %v4037_v6, 16  ;;  %v991_v28 = vrot.slane %v4040_v23, 1  ;;  %v4056_v6 = vld [vmem:[%s4233_s19 + $0x48] sm:$0xff]   ;;  %v4059_v23 = vld [vmem:[%s4233_s19 + $0xa4] ss:$0 sps:$4 sm:$0x11]  }
  0x78   : > { %1933 = vrot.lane.b32.xlu0 %v1890_v39, %s4185_s24  ;;  %v699_v39 = vrot.slane %v697_v32, 1 }
  0x79   : > { %v615_v19 = vrot.slane %v613_v14, 1  ;;  %v1607_v14 = vrot.slane %v1605_v5, 1 }
  0x7b   : > { %2125 = vrot.lane.b32.xlu1 %v4006_v40, %s4186_s25  ;;  %v601_v40 = vshll.u32 %v4025_v33, 16  ;;  %v4044_v33 = vld [vmem:[%s4233_s19 + $0x3c] sm:$0xfe]  }
  0x7c   : > { %2109 = vrot.lane.b32.xlu0 %v4007_v43, %s4186_s25  ;;  %v599_v43 = vor.u32 %v598_v34, %v594_v24  ;;  %v4041_v24 = vld [vmem:[%s4233_s19 + $0x38] ss:$0 sps:$4 sm:$0x11]  }
  0x7d   : > { %v603_v45 = vrot.slane %v601_v40, 1  ;;  %v992_v29 = vrot.slane %v4041_v24, 1 }
  0x7f   : > { %2127 = vrot.lane.b32.xlu1 %v4008_v50, %s4186_s25  ;;  %v700_v50 = vsel %vm544_vm1, %v695_v38, %v699_v39  ;;  %v604_v53 = vsel %vm544_vm1, %v599_v43, %v603_v45  ;;  %v994_v38 = vrot.slane %v4044_v33, 1  ;;  %v4046_v39 = vld [vmem:[%s4233_s19 + $0x9c] sm:$0xff]  }
  0x80   : > { %2111 = vrot.lane.b32.xlu0 %v4009_v51, %s4186_s25  ;;  %v2812_v51 = vrot.slane %v4028_v46, 1  ;;  %v4048_v46 = vld [vmem:[%s4233_s19 + $0xa8] sm:$0xff]  }
  0x82   : > { %v2814_v61 = vsel %vm978_vm0, %v2812_v51, %v2813_v54  ;;  %v1591_v51 = vshrl.u32 %v4050_v47, 16  ;;  %v4053_v54 = vld [vmem:[%s4233_s19 + $0x44] ss:$0 sps:$4 sm:$0x11]  }
  0x83   : > { %2558 = vrot.lane.b32.xlu1 %v2477_v10, %s4187_s26 }
  0x84   : > { %2542 = vrot.lane.b32.xlu0 %v2381_v15, %s4187_s26  ;;  %v4038_v15 = vld [vmem:[%s4233_s19 + $0x90] sm:$0xfe]   ;;  %v1596_v2 = vor.u32 %v1595_v59, %v1591_v51  ;;  %v4074_v59 = vld [vmem:[%s4233_s19 + $0xb0] ss:$0 sps:$4 sm:$0x11]  }
  0x85   : > { %v4433_v63 = vpop.permute.xlu1 %1221  ;;  %v1015_v20 = vrot.slane %v4038_v15, 1  ;;  %v1507_v15 = vshrl.u32 %v4056_v6, 16 }
  0x86   : > { %v4442_v11 = vpop.permute.xlu0 %1205 }
  0x87   : > { %2560 = vrot.lane.b32.xlu1 %v2489_v25, %s4187_s26  ;;  %v616_v25 = vsel %vm544_vm1, %v611_v18, %v615_v19  ;;  %v1608_v19 = vor.u32 %v1607_v14, %v1603_v4 }
  0x88   : > { %2544 = vrot.lane.b32.xlu0 %v2393_v30, %s4187_s26  ;;  %v4042_v30 = vld [vmem:[%s4233_s19 + $0x9c] sm:$0xfe]  }
  0x89   : > { %v4448_v22 = vpop.permute.xlu1 %1043  ;;  %v1018_v32 = vrot.slane %v4042_v30, 1  ;;  %v4060_v30 = vld [vmem:[%s4233_s19 + $0x3c] sm:$0xfe]  }
  0x8a   : > { %v1028_v31 = vpop.permute.xlu0 %1027 }
  0x8b   : > { %2847 = vrot.lane.b32.xlu1 %v2811_v36, %s4188_s27  ;;  %v4045_v36 = vld [vmem:[%s4233_s19 + $0x44] ss:$0 sps:$4 sm:$0x11]  }
  0x8c   : > { %2831 = vrot.lane.b32.xlu0 %v2787_v42, %s4188_s27  ;;  %v995_v41 = vrot.slane %v4045_v36, 1  ;;  %v4047_v42 = vld [vmem:[%s4233_s19 + $0x3c] sm:$0xff]   ;;  %v4062_v36 = vld [vmem:[%s4233_s19 + $0xa8] sm:$0xfe]  }
  0x8d   : > { %v1046_v37 = vpop.permute.xlu1 %1045 }
  0x8e   : > { %v1030_v44 = vpop.permute.xlu0 %1029  ;;  %v996_v43 = vsel %vm978_vm0, %v994_v38, %v995_v41 }
  0x8f   : > { %761 = vrot.lane.b32.xlu1 %v700_v50, %s4183_s22  ;;  %v4049_v50 = vld [vmem:[%s4233_s19 + $0x48] sm:$0xff]  }
  0x90   : > { %745 = vrot.lane.b32.xlu0 %v604_v53, %s4183_s22  ;;  %v1598_v53 = vshll.u32 %v4051_v48, 16 }
  0x91   : > { %v740_v57 = vpop.permute.xlu1 %739 }
  0x92   : > { %787 = vst.msk [vmem:[#allocation2 + $0x8] sm:$0xff] %vm785_vm3, %v740_v57  ;;  %v738_v60 = vpop.permute.xlu0 %737  ;;  %v1497_v57 = vshll.u32 %v4052_v49, 16  ;;  %v4066_v49 = vld [vmem:[%s4233_s19 + $0xa8] sm:$0xff]  }
  0x93   : > { %1077 = vst.msk [vmem:[#allocation2 + $0x8] sm:$0xff] %vm1075_vm4, %v1030_v44  ;;  %2849 = vrot.lane.b32.xlu1 %v2814_v61, %s4188_s27  ;;  %v1502_v61 = vshll.u32 %v4053_v54, 16  ;;  %v4071_v54 = vld [vmem:[%s4233_s19 + $0x18] sm:$0xff]  }
  0x94   : > { %786 = vst.msk [vmem:[#allocation2] sm:$0xff] %vm785_vm3, %v738_v60  ;;  %2833 = vrot.lane.b32.xlu0 %v2790_v1, %s4188_s27  ;;  %v1600_v60 = vrot.slane %v1598_v53, 1  ;;  %v1499_v0 = vrot.slane %v1497_v57, 1  ;;  %v4055_v1 = vld [vmem:[%s4233_s19 + $0xb0] ss:$0 sps:$4 sm:$0x11]  }
  0x95   : > { %1076 = vst.msk [vmem:[#allocation2] sm:$0xff] %vm1075_vm4, %v1028_v31  ;;  %v756_v10 = vpop.permute.xlu1 %755  ;;  %v4043_v31 = vld [vmem:[%s4233_s19 + $0xa4] ss:$0 sps:$4 sm:$0x11]   ;;  %v1504_v3 = vrot.slane %v1502_v61, 1  ;;  %v4068_v57 = vld [vmem:[%s4233_s19 + $0xb4] sm:$0xff]  }
  0x96   : > { %1254 = vst.msk [vmem:[#allocation2] sm:$0xff] %vm1253_vm5, %v4442_v11  ;;  %v754_v16 = vpop.permute.xlu0 %753  ;;  %v712_v11 = vsel %vm544_vm1, %v707_v9, %v711_v12  ;;  %v1019_v35 = vrot.slane %v4043_v31, 1  ;;  %v1500_v8 = vor.u32 %v1499_v0, %v1495_v56  ;;  %v1610_v9 = vshll.u32 %v4055_v1, 16  ;;  %v4061_v31 = vld [vmem:[%s4233_s19 + $0x44] ss:$0 sps:$4 sm:$0x11]  }
  0x97   : > { %795 = vst.msk [vmem:[#allocation2 + $0x48] sm:$0xff] %vm785_vm3, %v756_v10  ;;  %794 = vst.msk [vmem:[#allocation2 + $0x40] sm:$0xff] %vm785_vm3, %v754_v16  ;;  %763 = vrot.lane.b32.xlu1 %v712_v11, %s4183_s22  ;;  %v4057_v10 = vld [vmem:[%s4233_s19 + $0x50] ss:$0 sps:$4 sm:$0x11]   ;;  %v1601_v13 = vsel %vm544_vm1, %v1596_v2, %v1600_v60  ;;  %v1509_v16 = vshll.u32 %v4056_v6, 16 }
  0x98   : > { %1085 = vst.msk [vmem:[#allocation2 + $0x48] sm:$0xff] %vm1075_vm4, %v1046_v37  ;;  %1084 = vst.msk [vmem:[#allocation2 + $0x40] sm:$0xff] %vm1075_vm4, %v4448_v22  ;;  %747 = vrot.lane.b32.xlu0 %v616_v25, %s4183_s22  ;;  %v1017_v22 = vsel %vm978_vm0, %v1015_v20, %v1016_v21  ;;  %v1020_v40 = vsel %vm978_vm0, %v1018_v32, %v1019_v35  ;;  %v1505_v17 = vsel %vm544_vm1, %v1500_v8, %v1504_v3  ;;  %v4058_v21 = vld [vmem:[%s4233_s19 + $0x9c] sm:$0xfe]   ;;  %v4075_v60 = vld [vmem:[%s4233_s19 + $0x48] sm:$0xff]  }
  0x99   : > { %v1224_v26 = vpop.permute.xlu1 %1223  ;;  %1262 = vst.msk [vmem:[#allocation2 + $0x40] sm:$0xff] %vm1253_vm5, %v4433_v63  ;;  %v993_v63 = vsel %vm978_vm0, %v991_v28, %v992_v29  ;;  %v1612_v11 = vrot.slane %v1610_v9, 1  ;;  %v1514_v18 = vshll.u32 %v4057_v10, 16  ;;  %v1511_v20 = vrot.slane %v1509_v16, 1  ;;  %v4069_v61 = vld [vmem:[%s4233_s19 + $0x54] sm:$0xff]   ;;  %v4077_v8 = vld [vmem:[%s4997_s1 + $0x8] sm:$0xff]  }
  0x9a   : > { %1263 = vst.msk [vmem:[#allocation2 + $0x48] sm:$0xff] %vm1253_vm5, %v1224_v26  ;;  %v1208_v27 = vpop.permute.xlu0 %1207  ;;  %v1915_v28 = vrot.slane %v4058_v21, 1  ;;  %v1916_v29 = vrot.slane %v4059_v23, 1  ;;  %v1891_v32 = vrot.slane %v4060_v30, 1  ;;  %v1892_v35 = vrot.slane %v4061_v31, 1  ;;  %v4080_v16 = vld [vmem:[%s4233_s19 + $0x54] sm:$0xff]  }
  0x9b   : > { %1255 = vst.msk [vmem:[#allocation2 + $0x8] sm:$0xff] %vm1253_vm5, %v1208_v27  ;;  %1051 = vrot.lane.b32.xlu1 %v1017_v22, %s4182_s21  ;;  %v1516_v25 = vrot.slane %v1514_v18, 1  ;;  %v1613_v27 = vsel %vm544_vm1, %v1608_v19, %v1612_v11  ;;  %v1512_v22 = vor.u32 %v1511_v20, %v1507_v15  ;;  %v2498_v2 = vshll.u32 %v4074_v59, 16  ;;  %v4076_v3 = vld [vmem:[%s4233_s19 + $0x50] ss:$0 sps:$4 sm:$0x11]  }
  0x9c   : > { %1035 = vrot.lane.b32.xlu0 %v993_v63, %s4182_s21  ;;  %354 = vst.msk [vmem:[#allocation2 + $0x10] sm:$0xff] %vm351_vm2, %v4071_v54  ;;  %v2395_v4 = vshrl.u32 %v4075_v60, 16  ;;  %v2397_v5 = vshll.u32 %v4075_v60, 16  ;;  %v4079_v15 = vld [vmem:[%s4233_s19 + $0xbc] ss:$0 sps:$4 sm:$0x11]  }
  0x9d   : > { %v1655_v34 = vpop.permute.xlu1 %1654  ;;  %v1517_v63 = vsel %vm544_vm1, %v1512_v22, %v1516_v25  ;;  %v2500_v9 = vrot.slane %v2498_v2, 1  ;;  %v4082_v21 = vld [vmem:[%s4233_s19 + $0x84] sm:$0xff]   ;;  %v2510_v25 = vshll.u32 %v4079_v15, 16 }
  0x9e   : > { %1695 = vst.msk [vmem:[#allocation2 + $0x40] sm:$0xff] %vm1686_vm6, %v1655_v34  ;;  %v1639_v37 = vpop.permute.xlu0 %1638  ;;  %v1917_v34 = vsel %vm978_vm0, %v1915_v28, %v1916_v29  ;;  %v2399_v10 = vrot.slane %v2397_v5, 1  ;;  %v2407_v28 = vshrl.u32 %v4080_v16, 16  ;;  %v2409_v29 = vshll.u32 %v4080_v16, 16  ;;  %v4083_v30 = vld [vmem:[%s4233_s19 + $0x24] sm:$0xff]   ;;  %v4097_v5 = vld [vmem:[%s4233_s19 + $0xb4] sm:$0xff]  }
  0x9f   : > { %1687 = vst.msk [vmem:[#allocation2] sm:$0xff] %vm1686_vm6, %v1639_v37  ;;  %1053 = vrot.lane.b32.xlu1 %v1020_v40, %s4182_s21  ;;  %v4063_v37 = vld [vmem:[%s4233_s19 + $0xb0] ss:$0 sps:$4 sm:$0x11]   ;;  %v1918_v40 = vrot.slane %v4062_v36, 1  ;;  %v2512_v31 = vrot.slane %v2510_v25, 1 }
  0xa0   : > { %1037 = vrot.lane.b32.xlu0 %v996_v43, %s4182_s21  ;;  %v1919_v41 = vrot.slane %v4063_v37, 1  ;;  %v4065_v43 = vld [vmem:[%s4233_s19 + $0x50] ss:$0 sps:$4 sm:$0x11]   ;;  %v2400_v11 = vor.u32 %v2399_v10, %v2395_v4  ;;  %363 = vst.msk [vmem:[#allocation2 + $0x58] sm:$0xff] %vm351_vm2, %v4082_v21  ;;  %355 = vst.msk [vmem:[#allocation2 + $0x18] sm:$0xff] %vm351_vm2, %v4083_v30 }
  0xa1   : > { %v1657_v44 = vpop.permute.xlu1 %1656  ;;  %v1895_v48 = vrot.slane %v4065_v43, 1  ;;  %v4085_v43 = vld [vmem:[%s4233_s19 + $0xa8] sm:$0xfe]   ;;  %v4092_v4 = vld [vmem:[%s4233_s19 + $0x50] ss:$0 sps:$4 sm:$0x11]  }
  0xa2   : > { %1696 = vst.msk [vmem:[#allocation2 + $0x48] sm:$0xff] %vm1686_vm6, %v1657_v44  ;;  %v1641_v45 = vpop.permute.xlu0 %1640  ;;  %v625_v10 = vshll.u32 %v4092_v4, 16  ;;  %v4096_v25 = vld [vmem:[%s4233_s19 + $0x5c] ss:$0 sps:$4 sm:$0x11]  }
  0xa3   : > { %1688 = vst.msk [vmem:[#allocation2 + $0x8] sm:$0xff] %vm1686_vm6, %v1641_v45  ;;  %1229 = vrot.lane.b32.xlu1 %v4046_v39, %s4181_s20  ;;  %v1893_v39 = vsel %vm978_vm0, %v1891_v32, %v1892_v35  ;;  %v1920_v45 = vsel %vm978_vm0, %v1918_v40, %v1919_v41  ;;  %v2411_v35 = vrot.slane %v2409_v29, 1  ;;  %v4089_v40 = vld [vmem:[%s4233_s19 + $0xa8] sm:$0xff]   ;;  %v2795_v29 = vrot.slane %v4096_v25, 1  ;;  %v4112_v25 = vld [vmem:[%s4233_s19 + $0x60] sm:$0xff]  }
  0xa4   : > { %1213 = vrot.lane.b32.xlu0 %v4047_v42, %s4181_s20  ;;  %v4064_v42 = vld [vmem:[%s4233_s19 + $0x48] sm:$0xfe]  }
  0xa5   : > { %v1944_v55 = vpop.permute.xlu1 %1943 }
  0xa6   : > { %1984 = vst.msk [vmem:[#allocation2 + $0x40] sm:$0xff] %vm1975_vm7, %v1944_v55  ;;  %v1928_v58 = vpop.permute.xlu0 %1927  ;;  %v4072_v55 = vld [vmem:[%s4997_s1] sm:$0xff]  }
  0xa7   : > { %1976 = vst.msk [vmem:[#allocation2] sm:$0xff] %vm1975_vm7, %v1928_v58  ;;  %1231 = vrot.lane.b32.xlu1 %v4048_v46, %s4181_s20  ;;  %v1894_v46 = vrot.slane %v4064_v42, 1  ;;  %v4073_v58 = vld [vmem:[%s4233_s19 + $0xa8] sm:$0xff]   ;;  %3835 = vmatprep.subr.bf16.mxu0 %v4072_v55  ;;  %v2412_v42 = vor.u32 %v2411_v35, %v2407_v28  ;;  %v4100_v35 = vld [vmem:[%s4233_s19 + $0x5c] ss:$0 sps:$4 sm:$0x11]  }
  0xa8   : > { %1215 = vrot.lane.b32.xlu0 %v4049_v50, %s4181_s20  ;;  %v4070_v50 = vld [vmem:[%s4233_s19 + $0x78] sm:$0xff]   ;;  %3873 = vmatprep.subr.bf16.mxu1 %v4072_v55  ;;  %v2491_v62 = vshrl.u32 %v4073_v58, 16  ;;  %v2493_v0 = vshll.u32 %v4073_v58, 16  ;;  %v716_v58 = vshll.u32 %v4089_v40, 16 }
  0xa9   : > { %v1946_v7 = vpop.permute.xlu1 %1945  ;;  %v1896_v51 = vsel %vm978_vm0, %v1894_v46, %v1895_v48  ;;  %362 = vst.msk [vmem:[#allocation2 + $0x50] sm:$0xff] %vm351_vm2, %v4070_v50  ;;  %3836 = vmatpush3.bf16.msra.mxu0 %v4072_v55  ;;  %3876 = vmatpush3.bf16.msra.mxu1 %v4072_v55  ;;  %v2815_v48 = vrot.slane %v4085_v43, 1 }
  0xaa   : > { %1985 = vst.msk [vmem:[#allocation2 + $0x48] sm:$0xff] %vm1975_vm7, %v1946_v7  ;;  %v1930_v12 = vpop.permute.xlu0 %1929  ;;  %v2495_v7 = vrot.slane %v2493_v0, 1  ;;  %3837 = vmatprep.subr.bf16.mxu0 %v4077_v8  ;;  %3874 = vmatprep.subr.bf16.mxu1 %v4077_v8 }
  0xab   : > { %1977 = vst.msk [vmem:[#allocation2 + $0x8] sm:$0xff] %vm1975_vm7, %v1930_v12  ;;  %1662 = vrot.lane.b32.xlu1 %v1601_v13, %s4184_s23  ;;  %v2402_v12 = vshll.u32 %v4076_v3, 16  ;;  %v4078_v13 = vld [vmem:[%s4233_s19 + $0xb4] sm:$0xff]   ;;  %v4091_v3 = vld [vmem:[%s4233_s19 + $0x48] sm:$0xff]  }
  0xac   : > { %1646 = vrot.lane.b32.xlu0 %v1505_v17, %s4184_s23  ;;  %v2496_v14 = vor.u32 %v2495_v7, %v2491_v62  ;;  %v2503_v19 = vshrl.u32 %v4078_v13, 16  ;;  %v2505_v20 = vshll.u32 %v4078_v13, 16  ;;  %v4093_v13 = vld [vmem:[%s4233_s19 + $0xb4] sm:$0xfe]  }
  0xad   : > { %v2122_v24 = vpop.permute.xlu1 %2121  ;;  %v2404_v18 = vrot.slane %v2402_v12, 1  ;;  %3838 = vmatpush3.bf16.msra.mxu0 %v4077_v8  ;;  %3877 = vmatpush3.bf16.msra.mxu1 %v4077_v8  ;;  %v618_v8 = vshrl.u32 %v4091_v3, 16 }
  0xae   : > { %2162 = vst.msk [vmem:[#allocation2 + $0x40] sm:$0xff] %vm2153_vm8, %v2122_v24  ;;  %v2106_v26 = vpop.permute.xlu0 %2105  ;;  %v2501_v24 = vsel %vm544_vm1, %v2496_v14, %v2500_v9  ;;  %v2507_v22 = vrot.slane %v2505_v20, 1  ;;  %v620_v9 = vshll.u32 %v4091_v3, 16  ;;  %v726_v14 = vshrl.u32 %v4097_v5, 16  ;;  %v4099_v20 = vld [vmem:[%s4233_s19 + $0x54] sm:$0xff]  }
  0xaf   : > { %2154 = vst.msk [vmem:[#allocation2] sm:$0xff] %vm2153_vm8, %v2106_v26  ;;  %1664 = vrot.lane.b32.xlu1 %v1613_v27, %s4184_s23  ;;  %v4081_v26 = vld [vmem:[%s4233_s19 + $0x5c] ss:$0 sps:$4 sm:$0x11]   ;;  %v2405_v27 = vsel %vm544_vm1, %v2400_v11, %v2404_v18  ;;  %v627_v18 = vrot.slane %v625_v10, 1 }
  0xb0   : > { %1648 = vrot.lane.b32.xlu0 %v1517_v63, %s4184_s23  ;;  %v2414_v63 = vshll.u32 %v4081_v26, 16  ;;  %v622_v16 = vrot.slane %v620_v9, 1  ;;  %v4094_v11 = vld [vmem:[%s4233_s19 + $0xbc] ss:$0 sps:$4 sm:$0x11]   ;;  %v4113_v9 = vld [vmem:[%s4233_s19 + $0xb4] sm:$0xff]  }
  0xb1   : > { %v2124_v33 = vpop.permute.xlu1 %2123  ;;  %v4108_v3 = vld [vmem:[%s4233_s19 + $0x5c] ss:$0 sps:$4 sm:$0x11]  }
  0xb2   : > { %2163 = vst.msk [vmem:[#allocation2 + $0x48] sm:$0xff] %vm2153_vm8, %v2124_v33  ;;  %v2108_v38 = vpop.permute.xlu0 %2107  ;;  %v623_v21 = vor.u32 %v622_v16, %v618_v8  ;;  %v4109_v8 = vld [vmem:[%s4233_s19 + $0xb4] sm:$0xff]   ;;  %v1615_v16 = vshrl.u32 %v4113_v9, 16 }
  0xb3   : > { %2155 = vst.msk [vmem:[#allocation2 + $0x8] sm:$0xff] %vm2153_vm8, %v2108_v38  ;;  %1951 = vrot.lane.b32.xlu1 %v1917_v34, %s4185_s24  ;;  %v2508_v34 = vor.u32 %v2507_v22, %v2503_v19  ;;  %v2416_v38 = vrot.slane %v2414_v63, 1  ;;  %v2818_v19 = vrot.slane %v4093_v13, 1  ;;  %v728_v63 = vshll.u32 %v4097_v5, 16  ;;  %v4110_v13 = vld [vmem:[%s4233_s19 + $0x54] sm:$0xff]  }
  0xb4   : > { %1935 = vrot.lane.b32.xlu0 %v1893_v39, %s4185_s24  ;;  %v4084_v39 = vld [vmem:[%s4997_s1 + $0x10] ss:$0 sps:$4 sm:$0x33]  }
  0xb5   : > { %v2555_v44 = vpop.permute.xlu1 %2554  ;;  %v2513_v41 = vsel %vm544_vm1, %v2508_v34, %v2512_v31  ;;  %3879 = vmatprep.subr.msk.bf16.mxu0 %vm2984_vm12, %v4084_v39  ;;  %v2417_v46 = vsel %vm544_vm1, %v2412_v42, %v2416_v38  ;;  %3880 = vmatprep.subr.msk.bf16.mxu1 %vm2984_vm12, %v4084_v39  ;;  %v4098_v31 = vld [vmem:[%s4233_s19 + $0xbc] ss:$0 sps:$4 sm:$0x11]   ;;  %v4101_v42 = vld [vmem:[%s4233_s19 + $0xa8] sm:$0xfe]  }
  0xb6   : > { %2595 = vst.msk [vmem:[#allocation2 + $0x40] sm:$0xff] %vm2586_vm9, %v2555_v44  ;;  %v2539_v47 = vpop.permute.xlu0 %2538  ;;  %v2986_v44 = vsel %vm2984_vm12, %v4084_v39, 0  ;;  %v733_v34 = vshll.u32 %v4098_v31, 16 }
  0xb7   : > { %2587 = vst.msk [vmem:[#allocation2] sm:$0xff] %vm2586_vm9, %v2539_v47  ;;  %1953 = vrot.lane.b32.xlu1 %v1920_v45, %s4185_s24  ;;  %v4086_v45 = vld [vmem:[%s4233_s19 + $0xb0] ss:$0 sps:$4 sm:$0x11]   ;;  %3840 = vmatpush3.bf16.msra.mxu0 %v2986_v44 }
  0xb8   : > { %1937 = vrot.lane.b32.xlu0 %v1896_v51, %s4185_s24  ;;  %3878 = vmatpush3.bf16.msra.mxu1 %v2986_v44  ;;  %v2816_v51 = vrot.slane %v4086_v45, 1  ;;  %v735_v39 = vrot.slane %v733_v34, 1  ;;  %v4102_v45 = vld [vmem:[%s4233_s19 + $0xb0] ss:$0 sps:$4 sm:$0x11]  }
  0xb9   : > { %v2557_v53 = vpop.permute.xlu1 %2556 }
  0xba   : > { %2596 = vst.msk [vmem:[#allocation2 + $0x48] sm:$0xff] %vm2586_vm9, %v2557_v53  ;;  %v2541_v56 = vpop.permute.xlu0 %2540  ;;  %v4088_v53 = vld [vmem:[%s4233_s19 + $0x50] ss:$0 sps:$4 sm:$0x11]   ;;  %v2817_v54 = vsel %vm978_vm0, %v2815_v48, %v2816_v51  ;;  %v4103_v51 = vld [vmem:[%s4233_s19 + $0x48] sm:$0xfe]  }
  0xbb   : > { %2588 = vst.msk [vmem:[#allocation2 + $0x8] sm:$0xff] %vm2586_vm9, %v2541_v56  ;;  %2129 = vrot.lane.b32.xlu1 %v4066_v49, %s4186_s25  ;;  %v714_v49 = vshrl.u32 %v4089_v40, 16  ;;  %v2792_v56 = vrot.slane %v4088_v53, 1  ;;  %v637_v40 = vshll.u32 %v4100_v35, 16 }
  0xbc   : > { %2113 = vrot.lane.b32.xlu0 %v4067_v52, %s4186_s25  ;;  %v4087_v52 = vld [vmem:[%s4233_s19 + $0x48] sm:$0xfe]  }
  0xbd   : > { %v2844_v1 = vpop.permute.xlu1 %2843  ;;  %v2791_v55 = vrot.slane %v4087_v52, 1  ;;  %v4104_v52 = vld [vmem:[%s4233_s19 + $0x50] ss:$0 sps:$4 sm:$0x11]  }
  0xbe   : > { %2884 = vst.msk [vmem:[#allocation2 + $0x40] sm:$0xff] %vm2875_vm10, %v2844_v1  ;;  %v2828_v6 = vpop.permute.xlu0 %2827  ;;  %v718_v1 = vrot.slane %v716_v58, 1  ;;  %v998_v58 = vrot.slane %v4104_v52, 1  ;;  %v4122_v52 = vld [vmem:[%s4233_s19 + $0xbc] ss:$0 sps:$4 sm:$0x11]  }
  0xbf   : > { %2876 = vst.msk [vmem:[#allocation2] sm:$0xff] %vm2875_vm10, %v2828_v6  ;;  %2131 = vrot.lane.b32.xlu1 %v4068_v57, %s4186_s25  ;;  %v4090_v57 = vld [vmem:[%s4233_s19 + $0xb0] ss:$0 sps:$4 sm:$0x11]  }
  0xc0   : > { %2115 = vrot.lane.b32.xlu0 %v4069_v61, %s4186_s25  ;;  %v2793_v61 = vsel %vm978_vm0, %v2791_v55, %v2792_v56  ;;  %v721_v2 = vshll.u32 %v4090_v57, 16  ;;  %v719_v6 = vor.u32 %v718_v1, %v714_v49  ;;  %v997_v57 = vrot.slane %v4103_v51, 1 }
  0xc1   : > { %v758_v17 = vpop.permute.xlu1 %757 }
  0xc2   : > { %796 = vst.msk [vmem:[#allocation2 + $0x50] sm:$0xff] %vm785_vm3, %v758_v17  ;;  %v742_v23 = vpop.permute.xlu0 %741  ;;  %v723_v7 = vrot.slane %v721_v2, 1 }
  0xc3   : > { %788 = vst.msk [vmem:[#allocation2 + $0x10] sm:$0xff] %vm785_vm3, %v742_v23  ;;  %2562 = vrot.lane.b32.xlu1 %v2501_v24, %s4187_s26  ;;  %v2819_v23 = vrot.slane %v4094_v11, 1  ;;  %v4095_v24 = vld [vmem:[%s4233_s19 + $0x54] sm:$0xfe]  }
  0xc4   : > { %2546 = vrot.lane.b32.xlu0 %v2405_v27, %s4187_s26  ;;  %v724_v15 = vsel %vm544_vm1, %v719_v6, %v723_v7  ;;  %v628_v27 = vsel %vm544_vm1, %v623_v21, %v627_v18  ;;  %v2794_v28 = vrot.slane %v4095_v24, 1  ;;  %v1001_v7 = vrot.slane %v4108_v3, 1  ;;  %v4115_v11 = vld [vmem:[%s4233_s19 + $0x54] sm:$0xff]   ;;  %v4111_v18 = vld [vmem:[%s4233_s19 + $0xc0] sm:$0xff]  }
  0xc5   : > { %v2846_v32 = vpop.permute.xlu1 %2845  ;;  %v2900_v33 = vld [vmem:[#allocation2 + $0x40] sm:$0xff]  ;;  %v2820_v22 = vsel %vm978_vm0, %v2818_v19, %v2819_v23  ;;  %v4116_v23 = vld [vmem:[%s4233_s19 + $0x5c] ss:$0 sps:$4 sm:$0x11]   ;;  %v1519_v24 = vshrl.u32 %v4115_v11, 16 }
  0xc6   : > { %2885 = vst.msk [vmem:[#allocation2 + $0x48] sm:$0xff] %vm2875_vm10, %v2846_v32  ;;  %v2830_v36 = vpop.permute.xlu0 %2829  ;;  %v2892_v37 = vld [vmem:[#allocation2] sm:$0xff]  ;;  %3857 = vmatprep.mubr.msk.bf16.mxu1 %vm2935_vm11, %v2900_v33  ;;  %v630_v32 = vshrl.u32 %v4099_v20, 16  ;;  %v2796_v33 = vsel %vm978_vm0, %v2794_v28, %v2795_v29 }
  0xc7   : > { %2877 = vst.msk [vmem:[#allocation2 + $0x8] sm:$0xff] %vm2875_vm10, %v2830_v36  ;;  %3841 = vmatprep.mubr.msk.bf16.mxu0 %vm2935_vm11, %v2892_v37  ;;  %2564 = vrot.lane.b32.xlu1 %v2513_v41, %s4187_s26  ;;  %v730_v36 = vrot.slane %v728_v63, 1  ;;  %v632_v37 = vshll.u32 %v4099_v20, 16  ;;  %v4118_v63 = vld [vmem:[%s4233_s19 + $0xc8] ss:$0 sps:$4 sm:$0x11]  }
  0xc8   : > { %2548 = vrot.lane.b32.xlu0 %v2417_v46, %s4187_s26  ;;  %v639_v46 = vrot.slane %v637_v40, 1  ;;  %v1634_v40 = vshll.u32 %v4118_v63, 16 }
  0xc9   : > { %v760_v47 = vpop.permute.xlu1 %759  ;;  %v731_v43 = vor.u32 %v730_v36, %v726_v14  ;;  %v634_v44 = vrot.slane %v632_v37, 1  ;;  %v4119_v36 = vld [vmem:[%s4233_s19 + $0x60] sm:$0xff]  }
  0xca   : > { %797 = vst.msk [vmem:[#allocation2 + $0x58] sm:$0xff] %vm785_vm3, %v760_v47  ;;  %v744_v50 = vpop.permute.xlu0 %743  ;;  %v1021_v47 = vrot.slane %v4101_v42, 1 }
  0xcb   : > { %789 = vst.msk [vmem:[#allocation2 + $0x18] sm:$0xff] %vm785_vm3, %v744_v50  ;;  %2851 = vrot.lane.b32.xlu1 %v2817_v54, %s4188_s27  ;;  %v736_v48 = vsel %vm544_vm1, %v731_v43, %v735_v39  ;;  %v635_v49 = vor.u32 %v634_v44, %v630_v32  ;;  %v1022_v50 = vrot.slane %v4102_v45, 1  ;;  %v1531_v43 = vshrl.u32 %v4119_v36, 16 }
  0xcc   : > { %2835 = vrot.lane.b32.xlu0 %v2793_v61, %s4188_s27  ;;  %v999_v61 = vsel %vm978_vm0, %v997_v57, %v998_v58  ;;  %v1533_v44 = vshll.u32 %v4119_v36, 16  ;;  %v1922_v58 = vrot.slane %v4122_v52, 1  ;;  %v4139_v36 = vld [vmem:[%s4233_s19 + $0xcc] sm:$0xff]  }
  0xcd   : > { %v1048_v59 = vpop.permute.xlu1 %1047  ;;  %v2901_v60 = vld [vmem:[#allocation2 + $0x48] sm:$0xff]  ;;  %v640_v55 = vsel %vm544_vm1, %v635_v49, %v639_v46  ;;  %v1023_v56 = vsel %vm978_vm0, %v1021_v47, %v1022_v50  ;;  %v1636_v46 = vrot.slane %v1634_v40, 1 }
  0xce   : > { %1086 = vst.msk [vmem:[#allocation2 + $0x50] sm:$0xff] %vm1075_vm4, %v1048_v59  ;;  %v1032_v62 = vpop.permute.xlu0 %1031  ;;  %v2893_v0 = vld [vmem:[#allocation2 + $0x8] sm:$0xff]  ;;  %3858 = vmatmul.mubr.msk.bf16.vlgmr.msra.gmra.mrb[0].mxu1 %vm2935_vm11, %v2901_v60  ;;  %v4105_v59 = vld [vmem:[%s4233_s19 + $0xb4] sm:$0xfe]   ;;  %v1535_v50 = vrot.slane %v1533_v44, 1  ;;  %v2529_v44 = vshll.u32 %v4139_v36, 16 }
  0xcf   : > { %1078 = vst.msk [vmem:[#allocation2 + $0x10] sm:$0xff] %vm1075_vm4, %v1032_v62  ;;  %3842 = vmatmul.mubr.msk.bf16.vlgmr.msra.gmra.mrb[0].mxu0 %vm2935_vm11, %v2893_v0  ;;  %765 = vrot.lane.b32.xlu1 %v724_v15, %s4183_s22  ;;  %v4106_v60 = vld [vmem:[%s4233_s19 + $0xbc] ss:$0 sps:$4 sm:$0x11]   ;;  %v1024_v62 = vrot.slane %v4105_v59, 1  ;;  %v4141_v40 = vld [vmem:[%s4233_s19 + $0x6c] sm:$0xff]  }
  0xd0   : > { %749 = vrot.lane.b32.xlu0 %v628_v27, %s4183_s22  ;;  %v4107_v0 = vld [vmem:[%s4233_s19 + $0x54] sm:$0xfe]   ;;  %v1025_v2 = vrot.slane %v4106_v60, 1  ;;  %v4114_v15 = vld [vmem:[%s4233_s19 + $0xbc] ss:$0 sps:$4 sm:$0x11]   ;;  %v1536_v57 = vor.u32 %v1535_v50, %v1531_v43 }
  0xd1   : > { %v1050_v12 = vpop.permute.xlu1 %1049  ;;  %v1000_v5 = vrot.slane %v4107_v0, 1  ;;  %v1622_v21 = vshll.u32 %v4114_v15, 16  ;;  %v1521_v27 = vshll.u32 %v4115_v11, 16  ;;  %v4123_v59 = vld [vmem:[%s4233_s19 + $0x54] sm:$0xfe]   ;;  %v4129_v11 = vld [vmem:[%s4233_s19 + $0xc0] sm:$0xff]  }
  0xd2   : > { %1087 = vst.msk [vmem:[#allocation2 + $0x58] sm:$0xff] %vm1075_vm4, %v1050_v12  ;;  %v1034_v17 = vpop.permute.xlu0 %1033  ;;  %v1026_v6 = vsel %vm978_vm0, %v1024_v62, %v1025_v2  ;;  %v4124_v60 = vld [vmem:[%s4233_s19 + $0x5c] ss:$0 sps:$4 sm:$0x11]   ;;  %v1897_v62 = vrot.slane %v4123_v59, 1  ;;  %v2527_v43 = vshrl.u32 %v4139_v36, 16 }
  0xd3   : > { %1079 = vst.msk [vmem:[#allocation2 + $0x18] sm:$0xff] %vm1075_vm4, %v1034_v17  ;;  %2853 = vrot.lane.b32.xlu1 %v2820_v22, %s4188_s27  ;;  %v1002_v12 = vsel %vm978_vm0, %v1000_v5, %v1001_v7  ;;  %v1617_v17 = vshll.u32 %v4113_v9, 16  ;;  %v4117_v22 = vld [vmem:[%s4233_s19 + $0xc0] sm:$0xff]   ;;  %v1624_v29 = vrot.slane %v1622_v21, 1  ;;  %v1523_v31 = vrot.slane %v1521_v27, 1  ;;  %v4131_v27 = vld [vmem:[%s4233_s19 + $0xcc] sm:$0xff]  }
  0xd4   : > { %2837 = vrot.lane.b32.xlu0 %v2796_v33, %s4188_s27  ;;  %v1627_v32 = vshrl.u32 %v4117_v22, 16  ;;  %v1629_v33 = vshll.u32 %v4117_v22, 16  ;;  %v1898_v0 = vrot.slane %v4124_v60, 1  ;;  %v4125_v2 = vld [vmem:[%s4233_s19 + $0xc0] sm:$0xfe]   ;;  %v2531_v52 = vrot.slane %v2529_v44, 1 }
  0xd5   : > { %v1226_v26 = vpop.permute.xlu1 %1225  ;;  %v1619_v20 = vrot.slane %v1617_v17, 1  ;;  %v1524_v37 = vor.u32 %v1523_v31, %v1519_v24  ;;  %v4127_v7 = vld [vmem:[%s4233_s19 + $0x60] sm:$0xfe]   ;;  %v4128_v9 = vld [vmem:[%s4233_s19 + $0x68] ss:$0 sps:$4 sm:$0x11]  }
  0xd6   : > { %1264 = vst.msk [vmem:[#allocation2 + $0x50] sm:$0xff] %vm1253_vm5, %v1226_v26  ;;  %v1210_v30 = vpop.permute.xlu0 %1209  ;;  %v1631_v39 = vrot.slane %v1629_v33, 1  ;;  %v4130_v21 = vld [vmem:[%s4233_s19 + $0x60] sm:$0xff]   ;;  %v4138_v31 = vld [vmem:[%s4233_s19 + $0x68] ss:$0 sps:$4 sm:$0x11]  }
  0xd7   : > { %1256 = vst.msk [vmem:[#allocation2 + $0x10] sm:$0xff] %vm1253_vm5, %v1210_v30  ;;  %767 = vrot.lane.b32.xlu1 %v736_v48, %s4183_s22  ;;  %v1620_v28 = vor.u32 %v1619_v20, %v1615_v16  ;;  %v1526_v30 = vshll.u32 %v4116_v23, 16  ;;  %v4121_v48 = vld [vmem:[%s4233_s19 + $0xb4] sm:$0xfe]   ;;  %v4135_v24 = vld [vmem:[%s4233_s19 + $0xc0] sm:$0xff]   ;;  %v4132_v33 = vld [vmem:[%s4233_s19 + $0x6c] sm:$0xff]  }
  0xd8   : > { %751 = vrot.lane.b32.xlu0 %v640_v55, %s4183_s22  ;;  %v1632_v45 = vor.u32 %v1631_v39, %v1627_v32  ;;  %v1921_v55 = vrot.slane %v4121_v48, 1  ;;  %v4133_v16 = vld [vmem:[%s4233_s19 + $0x90] sm:$0xff]   ;;  %v2515_v22 = vshrl.u32 %v4135_v24, 16  ;;  %v2426_v39 = vshll.u32 %v4138_v31, 16  ;;  %v4144_v60 = vld [vmem:[%s4233_s19 + $0x3c] sm:$0xff]  }
  0xd9   : > { %v1228_v38 = vpop.permute.xlu1 %1227  ;;  %v1528_v34 = vrot.slane %v1526_v30, 1  ;;  %v1625_v42 = vsel %vm544_vm1, %v1620_v28, %v1624_v29  ;;  %364 = vst.msk [vmem:[#allocation2 + $0x60] sm:$0xff] %vm351_vm2, %v4133_v16  ;;  %v4134_v20 = vld [vmem:[%s4233_s19 + $0x30] sm:$0xff]   ;;  %v2517_v28 = vshll.u32 %v4135_v24, 16  ;;  %357 = vst.msk [vmem:[#allocation2 + $0x28] sm:$0xff] %vm351_vm2, %v4144_v60  ;;  %v4154_v24 = vld [vmem:[%s4233_s19 + $0x48] sm:$0xff]  }
  0xda   : > { %1265 = vst.msk [vmem:[#allocation2 + $0x58] sm:$0xff] %vm1253_vm5, %v1228_v38  ;;  %v1212_v41 = vpop.permute.xlu0 %1211  ;;  %v1923_v5 = vsel %vm978_vm0, %v1921_v55, %v1922_v58  ;;  %v2532_v58 = vor.u32 %v2531_v52, %v2527_v43 }
  0xdb   : > { %1257 = vst.msk [vmem:[#allocation2 + $0x18] sm:$0xff] %vm1253_vm5, %v1212_v41  ;;  %1055 = vrot.lane.b32.xlu1 %v1023_v56, %s4182_s21  ;;  %v4120_v41 = vld [vmem:[%s4233_s19 + $0x68] ss:$0 sps:$4 sm:$0x11]   ;;  %v1529_v49 = vsel %vm544_vm1, %v1524_v37, %v1528_v34  ;;  %v1637_v56 = vsel %vm544_vm1, %v1632_v45, %v1636_v46  ;;  %v4143_v45 = vld [vmem:[%s4233_s19 + $0x9c] sm:$0xff]  }
  0xdc   : > { %1039 = vrot.lane.b32.xlu0 %v999_v61, %s4182_s21  ;;  %v1538_v47 = vshll.u32 %v4120_v41, 16  ;;  %356 = vst.msk [vmem:[#allocation2 + $0x20] sm:$0xff] %vm351_vm2, %v4134_v20  ;;  %365 = vst.msk [vmem:[#allocation2 + $0x68] sm:$0xff] %vm351_vm2, %v4143_v45 }
  0xdd   : > { %v1659_v53 = vpop.permute.xlu1 %1658  ;;  %358 = vst.msk [vmem:[#allocation2 + $0x30] sm:$0xff] %vm351_vm2, %v4154_v24 }
  0xde   : > { %1697 = vst.msk [vmem:[#allocation2 + $0x50] sm:$0xff] %vm1686_vm6, %v1659_v53  ;;  %v1643_v54 = vpop.permute.xlu0 %1642  ;;  %v1540_v53 = vrot.slane %v1538_v47, 1  ;;  %v2428_v47 = vrot.slane %v2426_v39, 1 }
  0xdf   : > { %1689 = vst.msk [vmem:[#allocation2 + $0x10] sm:$0xff] %vm1686_vm6, %v1643_v54  ;;  %1057 = vrot.lane.b32.xlu1 %v1026_v6, %s4182_s21  ;;  %v1924_v6 = vrot.slane %v4125_v2, 1  ;;  %v4145_v2 = vld [vmem:[%s4233_s19 + $0xc0] sm:$0xfe]  }
  0xe0   : > { %1041 = vrot.lane.b32.xlu0 %v1002_v12, %s4182_s21  ;;  %v1541_v61 = vsel %vm544_vm1, %v1536_v57, %v1540_v53  ;;  %v1900_v12 = vrot.slane %v4127_v7, 1  ;;  %v2433_v57 = vshll.u32 %v4141_v40, 16 }
  0xe1   : > { %v1661_v1 = vpop.permute.xlu1 %1660 }
  0xe2   : > { %1698 = vst.msk [vmem:[#allocation2 + $0x58] sm:$0xff] %vm1686_vm6, %v1661_v1  ;;  %v1645_v4 = vpop.permute.xlu0 %1644 }
  0xe3   : > { %1690 = vst.msk [vmem:[#allocation2 + $0x18] sm:$0xff] %vm1686_vm6, %v1645_v4  ;;  %1233 = vrot.lane.b32.xlu1 %v4109_v8, %s4181_s20  ;;  %v4126_v4 = vld [vmem:[%s4233_s19 + $0xc8] ss:$0 sps:$4 sm:$0x11]  }
  0xe4   : > { %1217 = vrot.lane.b32.xlu0 %v4110_v13, %s4181_s20  ;;  %v1925_v8 = vrot.slane %v4126_v4, 1 }
  0xe5   : > { %v1948_v10 = vpop.permute.xlu1 %1947 }
  0xe6   : > { %1986 = vst.msk [vmem:[#allocation2 + $0x50] sm:$0xff] %vm1975_vm7, %v1948_v10  ;;  %v1932_v14 = vpop.permute.xlu0 %1931  ;;  %v1899_v10 = vsel %vm978_vm0, %v1897_v62, %v1898_v0  ;;  %v1926_v17 = vsel %vm978_vm0, %v1924_v6, %v1925_v8  ;;  %v2435_v62 = vrot.slane %v2433_v57, 1  ;;  %v4146_v6 = vld [vmem:[%s4233_s19 + $0xc8] ss:$0 sps:$4 sm:$0x11]   ;;  %v2821_v8 = vrot.slane %v4145_v2, 1 }
  0xe7   : > { %1978 = vst.msk [vmem:[#allocation2 + $0x10] sm:$0xff] %vm1975_vm7, %v1932_v14  ;;  %1235 = vrot.lane.b32.xlu1 %v4111_v18, %s4181_s20  ;;  %v1901_v14 = vrot.slane %v4128_v9, 1  ;;  %v4153_v9 = vld [vmem:[%s4233_s19 + $0xa8] sm:$0xff]  }
  0xe8   : > { %1219 = vrot.lane.b32.xlu0 %v4112_v25, %s4181_s20  ;;  %v4136_v25 = vld [vmem:[%s4233_s19 + $0xc8] ss:$0 sps:$4 sm:$0x11]   ;;  %366 = vst.msk [vmem:[#allocation2 + $0x70] sm:$0xff] %vm351_vm2, %v4153_v9 }
  0xe9   : > { %v1950_v19 = vpop.permute.xlu1 %1949  ;;  %v1902_v18 = vsel %vm978_vm0, %v1900_v12, %v1901_v14  ;;  %v2522_v30 = vshll.u32 %v4136_v25, 16  ;;  %v2822_v12 = vrot.slane %v4146_v6, 1  ;;  %v4148_v14 = vld [vmem:[%s4233_s19 + $0x68] ss:$0 sps:$4 sm:$0x11]  }
  0xea   : > { %1987 = vst.msk [vmem:[#allocation2 + $0x58] sm:$0xff] %vm1975_vm7, %v1950_v19  ;;  %v1934_v26 = vpop.permute.xlu0 %1933 }
  0xeb   : > { %1979 = vst.msk [vmem:[#allocation2 + $0x18] sm:$0xff] %vm1975_vm7, %v1934_v26  ;;  %1666 = vrot.lane.b32.xlu1 %v1625_v42, %s4184_s23  ;;  %v4137_v26 = vld [vmem:[%s4233_s19 + $0x60] sm:$0xff]   ;;  %v2524_v37 = vrot.slane %v2522_v30, 1  ;;  %v4140_v42 = vld [vmem:[%s4233_s19 + $0xd4] ss:$0 sps:$4 sm:$0x11]  }
  0xec   : > { %1650 = vrot.lane.b32.xlu0 %v1529_v49, %s4184_s23  ;;  %v2419_v63 = vshrl.u32 %v4137_v26, 16  ;;  %v2421_v32 = vshll.u32 %v4137_v26, 16  ;;  %v2534_v53 = vshll.u32 %v4140_v42, 16  ;;  %v4155_v30 = vld [vmem:[%s4233_s19 + $0xb4] sm:$0xff]  }
  0xed   : > { %v2126_v35 = vpop.permute.xlu1 %2125  ;;  %367 = vst.msk [vmem:[#allocation2 + $0x78] sm:$0xff] %vm351_vm2, %v4155_v30 }
  0xee   : > { %2164 = vst.msk [vmem:[#allocation2 + $0x50] sm:$0xff] %vm2153_vm8, %v2126_v35  ;;  %v2110_v38 = vpop.permute.xlu0 %2109  ;;  %v2519_v35 = vrot.slane %v2517_v28, 1  ;;  %v2536_v59 = vrot.slane %v2534_v53, 1 }
  0xef   : > { %2156 = vst.msk [vmem:[#allocation2 + $0x10] sm:$0xff] %vm2153_vm8, %v2110_v38  ;;  %1668 = vrot.lane.b32.xlu1 %v1637_v56, %s4184_s23  ;;  %v2423_v38 = vrot.slane %v2421_v32, 1  ;;  %v4142_v56 = vld [vmem:[%s4233_s19 + $0x74] ss:$0 sps:$4 sm:$0x11]  }
  0xf0   : > { %1652 = vrot.lane.b32.xlu0 %v1541_v61, %s4184_s23  ;;  %v2520_v41 = vor.u32 %v2519_v35, %v2515_v22  ;;  %v2438_v0 = vshll.u32 %v4142_v56, 16  ;;  %v4151_v22 = vld [vmem:[%s4233_s19 + $0x6c] sm:$0xfe]  }
  0xf1   : > { %v2128_v51 = vpop.permute.xlu1 %2127  ;;  %v2424_v46 = vor.u32 %v2423_v38, %v2419_v63  ;;  %v2800_v63 = vrot.slane %v4151_v22, 1 }
  0xf2   : > { %2165 = vst.msk [vmem:[#allocation2 + $0x58] sm:$0xff] %vm2153_vm8, %v2128_v51  ;;  %v2112_v54 = vpop.permute.xlu0 %2111  ;;  %v2525_v55 = vsel %vm544_vm1, %v2520_v41, %v2524_v37 }
  0xf3   : > { %2157 = vst.msk [vmem:[#allocation2 + $0x18] sm:$0xff] %vm2153_vm8, %v2112_v54  ;;  %1955 = vrot.lane.b32.xlu1 %v1923_v5, %s4185_s24  ;;  %v2431_v54 = vshrl.u32 %v4141_v40, 16  ;;  %v2429_v61 = vsel %vm544_vm1, %v2424_v46, %v2428_v47  ;;  %v2440_v5 = vrot.slane %v2438_v0, 1 }
  0xf4   : > { %1939 = vrot.lane.b32.xlu0 %v1899_v10, %s4185_s24 }
  0xf5   : > { %v2559_v1 = vpop.permute.xlu1 %2558  ;;  %v2436_v4 = vor.u32 %v2435_v62, %v2431_v54 }
  0xf6   : > { %2597 = vst.msk [vmem:[#allocation2 + $0x50] sm:$0xff] %vm2586_vm9, %v2559_v1  ;;  %v2543_v3 = vpop.permute.xlu0 %2542 }
  0xf7   : > { %2589 = vst.msk [vmem:[#allocation2 + $0x10] sm:$0xff] %vm2586_vm9, %v2543_v3  ;;  %1957 = vrot.lane.b32.xlu1 %v1926_v17, %s4185_s24  ;;  %v2537_v3 = vsel %vm544_vm1, %v2532_v58, %v2536_v59  ;;  %v2441_v10 = vsel %vm544_vm1, %v2436_v4, %v2440_v5 }
  0xf8   : > { %1941 = vrot.lane.b32.xlu0 %v1902_v18, %s4185_s24 }
  0xf9   : > { %v2561_v13 = vpop.permute.xlu1 %2560 }
  0xfa   : > { %2598 = vst.msk [vmem:[#allocation2 + $0x58] sm:$0xff] %vm2586_vm9, %v2561_v13  ;;  %v2545_v15 = vpop.permute.xlu0 %2544  ;;  %v4147_v13 = vld [vmem:[%s4233_s19 + $0x60] sm:$0xfe]  }
  0xfb   : > { %2590 = vst.msk [vmem:[#allocation2 + $0x18] sm:$0xff] %vm2586_vm9, %v2545_v15  ;;  %2133 = vrot.lane.b32.xlu1 %v4129_v11, %s4186_s25  ;;  %v2823_v11 = vsel %vm978_vm0, %v2821_v8, %v2822_v12  ;;  %v2797_v18 = vrot.slane %v4147_v13, 1 }
  0xfc   : > { %2117 = vrot.lane.b32.xlu0 %v4130_v21, %s4186_s25  ;;  %v4149_v21 = vld [vmem:[%s4233_s19 + $0xcc] sm:$0xfe]  }
  0xfd   : > { %v2848_v19 = vpop.permute.xlu1 %2847  ;;  %v2824_v26 = vrot.slane %v4149_v21, 1 }
  0xfe   : > { %2886 = vst.msk [vmem:[#allocation2 + $0x50] sm:$0xff] %vm2875_vm10, %v2848_v19  ;;  %v2832_v23 = vpop.permute.xlu0 %2831  ;;  %v2798_v19 = vrot.slane %v4148_v14, 1 }
  0xff   : > { %2878 = vst.msk [vmem:[#allocation2 + $0x10] sm:$0xff] %vm2875_vm10, %v2832_v23  ;;  %2135 = vrot.lane.b32.xlu1 %v4131_v27, %s4186_s25  ;;  %v4150_v23 = vld [vmem:[%s4233_s19 + $0xd4] ss:$0 sps:$4 sm:$0x11]  }
 0x100   : > { %2119 = vrot.lane.b32.xlu0 %v4132_v33, %s4186_s25  ;;  %v2799_v25 = vsel %vm978_vm0, %v2797_v18, %v2798_v19  ;;  %v2825_v27 = vrot.slane %v4150_v23, 1  ;;  %v4156_v33 = vld [vmem:[%s4233_s19 + $0x54] sm:$0xff]  }
 0x101   : > { %v762_v29 = vpop.permute.xlu1 %761  ;;  %359 = vst.msk [vmem:[#allocation2 + $0x38] sm:$0xff] %vm351_vm2, %v4156_v33 }
 0x102   : > { %798 = vst.msk [vmem:[#allocation2 + $0x60] sm:$0xff] %vm785_vm3, %v762_v29  ;;  %v746_v34 = vpop.permute.xlu0 %745  ;;  %v4152_v29 = vld [vmem:[%s4233_s19 + $0x74] ss:$0 sps:$4 sm:$0x11]   ;;  %v2826_v31 = vsel %vm978_vm0, %v2824_v26, %v2825_v27 }
 0x103   : > { %790 = vst.msk [vmem:[#allocation2 + $0x20] sm:$0xff] %vm785_vm3, %v746_v34  ;;  %2566 = vrot.lane.b32.xlu1 %v2525_v55, %s4187_s26  ;;  %v2801_v34 = vrot.slane %v4152_v29, 1 }
 0x104   : > { %2550 = vrot.lane.b32.xlu0 %v2429_v61, %s4187_s26 }
 0x105   : > { %v2850_v48 = vpop.permute.xlu1 %2849  ;;  %v2902_v49 = vld [vmem:[#allocation2 + $0x50] sm:$0xff]  ;;  %v2802_v36 = vsel %vm978_vm0, %v2800_v63, %v2801_v34 }
 0x106   : > { %2887 = vst.msk [vmem:[#allocation2 + $0x58] sm:$0xff] %vm2875_vm10, %v2850_v48  ;;  %v2834_v50 = vpop.permute.xlu0 %2833  ;;  %v2894_v51 = vld [vmem:[#allocation2 + $0x10] sm:$0xff]  ;;  %3861 = vmatprep.mubr.msk.bf16.mxu1 %vm2935_vm11, %v2902_v49 }
 0x107   : > { %2879 = vst.msk [vmem:[#allocation2 + $0x18] sm:$0xff] %vm2875_vm10, %v2834_v50  ;;  %3845 = vmatprep.mubr.msk.bf16.mxu0 %vm2935_vm11, %v2894_v51  ;;  %2568 = vrot.lane.b32.xlu1 %v2537_v3, %s4187_s26 }
 0x108   : > { %2552 = vrot.lane.b32.xlu0 %v2441_v10, %s4187_s26 }
 0x109   : > { %v764_v1 = vpop.permute.xlu1 %763 }
 0x10a   : > { %799 = vst.msk [vmem:[#allocation2 + $0x68] sm:$0xff] %vm785_vm3, %v764_v1  ;;  %v748_v7 = vpop.permute.xlu0 %747 }
 0x10b   : > { %791 = vst.msk [vmem:[#allocation2 + $0x28] sm:$0xff] %vm785_vm3, %v748_v7  ;;  %2855 = vrot.lane.b32.xlu1 %v2823_v11, %s4188_s27 }
 0x10c   : > { %2839 = vrot.lane.b32.xlu0 %v2799_v25, %s4188_s27 }
 0x10d   : > { %v1052_v15 = vpop.permute.xlu1 %1051  ;;  %v2903_v17 = vld [vmem:[#allocation2 + $0x58] sm:$0xff] }
 0x10e   : > { %v2895_v16 = vld [vmem:[#allocation2 + $0x18] sm:$0xff]  ;;  %1088 = vst.msk [vmem:[#allocation2 + $0x60] sm:$0xff] %vm1075_vm4, %v1052_v15  ;;  %3862 = vmatmul.mubr.msk.bf16.gmra.mrb[4].mxu1 %vm2935_vm11, %v2903_v17  ;;  %v1036_v20 = vpop.permute.xlu0 %1035 }
 0x10f   : > { %3846 = vmatmul.mubr.msk.bf16.gmra.mrb[4].mxu0 %vm2935_vm11, %v2895_v16  ;;  %1080 = vst.msk [vmem:[#allocation2 + $0x20] sm:$0xff] %vm1075_vm4, %v1036_v20  ;;  %2857 = vrot.lane.b32.xlu1 %v2826_v31, %s4188_s27 }
 0x110   : > { %2841 = vrot.lane.b32.xlu0 %v2802_v36, %s4188_s27  ;;  %v4884_v36 = vld [vmem:[%s4998_s2] ss:$0 sm:$0xff] }
 0x111   : > { %v1054_v28 = vpop.permute.xlu1 %1053 }
 0x112   : > { %1089 = vst.msk [vmem:[#allocation2 + $0x68] sm:$0xff] %vm1075_vm4, %v1054_v28  ;;  %v1038_v32 = vpop.permute.xlu0 %1037 }
 0x113   : > { %1081 = vst.msk [vmem:[#allocation2 + $0x28] sm:$0xff] %vm1075_vm4, %v1038_v32 }
 0x115   : > { %v1230_v35 = vpop.permute.xlu1 %1229 }
 0x116   : > { %1266 = vst.msk [vmem:[#allocation2 + $0x60] sm:$0xff] %vm1253_vm5, %v1230_v35  ;;  %v1214_v37 = vpop.permute.xlu0 %1213 }
 0x117   : > { %1258 = vst.msk [vmem:[#allocation2 + $0x20] sm:$0xff] %vm1253_vm5, %v1214_v37 }
 0x119   : > { %v1232_v38 = vpop.permute.xlu1 %1231 }
 0x11a   : > { %1267 = vst.msk [vmem:[#allocation2 + $0x68] sm:$0xff] %vm1253_vm5, %v1232_v38  ;;  %v1216_v39 = vpop.permute.xlu0 %1215 }
 0x11b   : > { %1259 = vst.msk [vmem:[#allocation2 + $0x28] sm:$0xff] %vm1253_vm5, %v1216_v39 }
 0x11d   : > { %v1663_v40 = vpop.permute.xlu1 %1662 }
 0x11e   : > { %1699 = vst.msk [vmem:[#allocation2 + $0x60] sm:$0xff] %vm1686_vm6, %v1663_v40  ;;  %v1647_v41 = vpop.permute.xlu0 %1646 }
 0x11f   : > { %1691 = vst.msk [vmem:[#allocation2 + $0x20] sm:$0xff] %vm1686_vm6, %v1647_v41 }
 0x121   : > { %v1665_v42 = vpop.permute.xlu1 %1664 }
 0x122   : > { %1700 = vst.msk [vmem:[#allocation2 + $0x68] sm:$0xff] %vm1686_vm6, %v1665_v42  ;;  %v1649_v43 = vpop.permute.xlu0 %1648 }
 0x123   : > { %1692 = vst.msk [vmem:[#allocation2 + $0x28] sm:$0xff] %vm1686_vm6, %v1649_v43 }
 0x125   : > { %v1952_v44 = vpop.permute.xlu1 %1951 }
 0x126   : > { %1988 = vst.msk [vmem:[#allocation2 + $0x60] sm:$0xff] %vm1975_vm7, %v1952_v44  ;;  %v1936_v45 = vpop.permute.xlu0 %1935 }
 0x127   : > { %1980 = vst.msk [vmem:[#allocation2 + $0x20] sm:$0xff] %vm1975_vm7, %v1936_v45 }
 0x129   : > { %v1954_v46 = vpop.permute.xlu1 %1953 }
 0x12a   : > { %1989 = vst.msk [vmem:[#allocation2 + $0x68] sm:$0xff] %vm1975_vm7, %v1954_v46  ;;  %v1938_v47 = vpop.permute.xlu0 %1937 }
 0x12b   : > { %1981 = vst.msk [vmem:[#allocation2 + $0x28] sm:$0xff] %vm1975_vm7, %v1938_v47 }
 0x12d   : > { %v2130_v48 = vpop.permute.xlu1 %2129 }
 0x12e   : > { %2166 = vst.msk [vmem:[#allocation2 + $0x60] sm:$0xff] %vm2153_vm8, %v2130_v48  ;;  %v2114_v49 = vpop.permute.xlu0 %2113 }
 0x12f   : > { %2158 = vst.msk [vmem:[#allocation2 + $0x20] sm:$0xff] %vm2153_vm8, %v2114_v49 }
 0x131   : > { %v2132_v50 = vpop.permute.xlu1 %2131 }
 0x132   : > { %2167 = vst.msk [vmem:[#allocation2 + $0x68] sm:$0xff] %vm2153_vm8, %v2132_v50  ;;  %v2116_v51 = vpop.permute.xlu0 %2115 }
 0x133   : > { %2159 = vst.msk [vmem:[#allocation2 + $0x28] sm:$0xff] %vm2153_vm8, %v2116_v51 }
 0x135   : > { %v2563_v52 = vpop.permute.xlu1 %2562 }
 0x136   : > { %2599 = vst.msk [vmem:[#allocation2 + $0x60] sm:$0xff] %vm2586_vm9, %v2563_v52  ;;  %v2547_v53 = vpop.permute.xlu0 %2546 }
 0x137   : > { %2591 = vst.msk [vmem:[#allocation2 + $0x20] sm:$0xff] %vm2586_vm9, %v2547_v53 }
 0x139   : > { %v2565_v54 = vpop.permute.xlu1 %2564 }
 0x13a   : > { %2600 = vst.msk [vmem:[#allocation2 + $0x68] sm:$0xff] %vm2586_vm9, %v2565_v54  ;;  %v2549_v55 = vpop.permute.xlu0 %2548 }
 0x13b   : > { %2592 = vst.msk [vmem:[#allocation2 + $0x28] sm:$0xff] %vm2586_vm9, %v2549_v55 }
 0x13d   : > { %v2852_v56 = vpop.permute.xlu1 %2851 }
 0x13e   : > { %2888 = vst.msk [vmem:[#allocation2 + $0x60] sm:$0xff] %vm2875_vm10, %v2852_v56  ;;  %v2836_v57 = vpop.permute.xlu0 %2835 }
 0x13f   : > { %2880 = vst.msk [vmem:[#allocation2 + $0x20] sm:$0xff] %vm2875_vm10, %v2836_v57 }
 0x141   : > { %v766_v58 = vpop.permute.xlu1 %765 }
 0x142   : > { %800 = vst.msk [vmem:[#allocation2 + $0x70] sm:$0xff] %vm785_vm3, %v766_v58  ;;  %v750_v60 = vpop.permute.xlu0 %749 }
 0x143   : > { %792 = vst.msk [vmem:[#allocation2 + $0x30] sm:$0xff] %vm785_vm3, %v750_v60 }
 0x145   : > { %v2904_v59 = vld [vmem:[#allocation2 + $0x60] sm:$0xff]  ;;  %v2854_v61 = vpop.permute.xlu1 %2853 }
 0x146   : > { %3865 = vmatprep.mubr.msk.bf16.mxu1 %vm2935_vm11, %v2904_v59  ;;  %v2896_v62 = vld [vmem:[#allocation2 + $0x20] sm:$0xff]  ;;  %2889 = vst.msk [vmem:[#allocation2 + $0x68] sm:$0xff] %vm2875_vm10, %v2854_v61  ;;  %v2838_v0 = vpop.permute.xlu0 %2837 }
 0x147   : > { %3849 = vmatprep.mubr.msk.bf16.mxu0 %vm2935_vm11, %v2896_v62  ;;  %2881 = vst.msk [vmem:[#allocation2 + $0x28] sm:$0xff] %vm2875_vm10, %v2838_v0 }
 0x149   : > { %v768_v1 = vpop.permute.xlu1 %767 }
 0x14a   : > { %801 = vst.msk [vmem:[#allocation2 + $0x78] sm:$0xff] %vm785_vm3, %v768_v1  ;;  %v752_v3 = vpop.permute.xlu0 %751 }
 0x14b   : > { %793 = vst.msk [vmem:[#allocation2 + $0x38] sm:$0xff] %vm785_vm3, %v752_v3 }
 0x14d   : > { %v2905_v2 = vld [vmem:[#allocation2 + $0x68] sm:$0xff]  ;;  %v1056_v4 = vpop.permute.xlu1 %1055 }
 0x14e   : > { %3866 = vmatmul.mubr.msk.bf16.gmra.mrb[8].mxu1 %vm2935_vm11, %v2905_v2  ;;  %1090 = vst.msk [vmem:[#allocation2 + $0x70] sm:$0xff] %vm1075_vm4, %v1056_v4  ;;  %v2897_v5 = vld [vmem:[#allocation2 + $0x28] sm:$0xff]  ;;  %v1040_v6 = vpop.permute.xlu0 %1039 }
 0x14f   : > { %3850 = vmatmul.mubr.msk.bf16.gmra.mrb[8].mxu0 %vm2935_vm11, %v2897_v5  ;;  %1082 = vst.msk [vmem:[#allocation2 + $0x30] sm:$0xff] %vm1075_vm4, %v1040_v6 }
 0x151   : > { %v1058_v7 = vpop.permute.xlu1 %1057 }
 0x152   : > { %1091 = vst.msk [vmem:[#allocation2 + $0x78] sm:$0xff] %vm1075_vm4, %v1058_v7  ;;  %v1042_v8 = vpop.permute.xlu0 %1041 }
 0x153   : > { %1083 = vst.msk [vmem:[#allocation2 + $0x38] sm:$0xff] %vm1075_vm4, %v1042_v8 }
 0x155   : > { %v1234_v9 = vpop.permute.xlu1 %1233 }
 0x156   : > { %1268 = vst.msk [vmem:[#allocation2 + $0x70] sm:$0xff] %vm1253_vm5, %v1234_v9  ;;  %v1218_v10 = vpop.permute.xlu0 %1217 }
 0x157   : > { %1260 = vst.msk [vmem:[#allocation2 + $0x30] sm:$0xff] %vm1253_vm5, %v1218_v10 }
 0x159   : > { %v1236_v12 = vpop.permute.xlu1 %1235 }
 0x15a   : > { %1269 = vst.msk [vmem:[#allocation2 + $0x78] sm:$0xff] %vm1253_vm5, %v1236_v12  ;;  %v1220_v13 = vpop.permute.xlu0 %1219 }
 0x15b   : > { %1261 = vst.msk [vmem:[#allocation2 + $0x38] sm:$0xff] %vm1253_vm5, %v1220_v13 }
 0x15d   : > { %v1667_v14 = vpop.permute.xlu1 %1666 }
 0x15e   : > { %1701 = vst.msk [vmem:[#allocation2 + $0x70] sm:$0xff] %vm1686_vm6, %v1667_v14  ;;  %v1651_v15 = vpop.permute.xlu0 %1650 }
 0x15f   : > { %1693 = vst.msk [vmem:[#allocation2 + $0x30] sm:$0xff] %vm1686_vm6, %v1651_v15 }
 0x161   : > { %v1669_v16 = vpop.permute.xlu1 %1668 }
 0x162   : > { %1702 = vst.msk [vmem:[#allocation2 + $0x78] sm:$0xff] %vm1686_vm6, %v1669_v16  ;;  %v1653_v17 = vpop.permute.xlu0 %1652 }
 0x163   : > { %1694 = vst.msk [vmem:[#allocation2 + $0x38] sm:$0xff] %vm1686_vm6, %v1653_v17 }
 0x165   : > { %v1956_v11 = vpop.permute.xlu1 %1955 }
 0x166   : > { %1990 = vst.msk [vmem:[#allocation2 + $0x70] sm:$0xff] %vm1975_vm7, %v1956_v11  ;;  %v1940_v18 = vpop.permute.xlu0 %1939 }
 0x167   : > { %1982 = vst.msk [vmem:[#allocation2 + $0x30] sm:$0xff] %vm1975_vm7, %v1940_v18 }
 0x169   : > { %v1958_v19 = vpop.permute.xlu1 %1957 }
 0x16a   : > { %1991 = vst.msk [vmem:[#allocation2 + $0x78] sm:$0xff] %vm1975_vm7, %v1958_v19  ;;  %v1942_v20 = vpop.permute.xlu0 %1941 }
 0x16b   : > { %1983 = vst.msk [vmem:[#allocation2 + $0x38] sm:$0xff] %vm1975_vm7, %v1942_v20 }
 0x16d   : > { %v2134_v21 = vpop.permute.xlu1 %2133 }
 0x16e   : > { %2168 = vst.msk [vmem:[#allocation2 + $0x70] sm:$0xff] %vm2153_vm8, %v2134_v21  ;;  %v2118_v23 = vpop.permute.xlu0 %2117 }
 0x16f   : > { %2160 = vst.msk [vmem:[#allocation2 + $0x30] sm:$0xff] %vm2153_vm8, %v2118_v23 }
 0x171   : > { %v2136_v24 = vpop.permute.xlu1 %2135 }
 0x172   : > { %2169 = vst.msk [vmem:[#allocation2 + $0x78] sm:$0xff] %vm2153_vm8, %v2136_v24  ;;  %v2120_v25 = vpop.permute.xlu0 %2119 }
 0x173   : > { %2161 = vst.msk [vmem:[#allocation2 + $0x38] sm:$0xff] %vm2153_vm8, %v2120_v25 }
 0x175   : > { %v2567_v26 = vpop.permute.xlu1 %2566 }
 0x176   : > { %2601 = vst.msk [vmem:[#allocation2 + $0x70] sm:$0xff] %vm2586_vm9, %v2567_v26  ;;  %v2551_v27 = vpop.permute.xlu0 %2550 }
 0x177   : > { %2593 = vst.msk [vmem:[#allocation2 + $0x30] sm:$0xff] %vm2586_vm9, %v2551_v27 }
 0x179   : > { %v2569_v22 = vpop.permute.xlu1 %2568 }
 0x17a   : > { %2602 = vst.msk [vmem:[#allocation2 + $0x78] sm:$0xff] %vm2586_vm9, %v2569_v22  ;;  %v2553_v28 = vpop.permute.xlu0 %2552 }
 0x17b   : > { %2594 = vst.msk [vmem:[#allocation2 + $0x38] sm:$0xff] %vm2586_vm9, %v2553_v28 }
 0x17d   : > { %v2856_v29 = vpop.permute.xlu1 %2855 }
 0x17e   : > { %2890 = vst.msk [vmem:[#allocation2 + $0x70] sm:$0xff] %vm2875_vm10, %v2856_v29  ;;  %v2840_v30 = vpop.permute.xlu0 %2839 }
 0x17f   : > { %2882 = vst.msk [vmem:[#allocation2 + $0x30] sm:$0xff] %vm2875_vm10, %v2840_v30 }
 0x181   : > { %v2858_v31 = vpop.permute.xlu1 %2857 }
 0x182   : > { %2891 = vst.msk [vmem:[#allocation2 + $0x78] sm:$0xff] %vm2875_vm10, %v2858_v31  ;;  %v2842_v63 = vpop.permute.xlu0 %2841 }
 0x183   : > { %2883 = vst.msk [vmem:[#allocation2 + $0x38] sm:$0xff] %vm2875_vm10, %v2842_v63 }
 0x185   : > { %v2906_v32 = vld [vmem:[#allocation2 + $0x70] sm:$0xff] }
 0x186   : > { %3869 = vmatprep.mubr.msk.bf16.mxu1 %vm2935_vm11, %v2906_v32  ;;  %v2898_v33 = vld [vmem:[#allocation2 + $0x30] sm:$0xff] }
 0x187   : > { %3853 = vmatprep.mubr.msk.bf16.mxu0 %vm2935_vm11, %v2898_v33 }
 0x189   : > { %v2907_v34 = vld [vmem:[#allocation2 + $0x78] sm:$0xff] }
 0x18a   : > { %3870 = vmatmul.mubr.msk.bf16.gmra.mrb[12].mxu1 %vm2935_vm11, %v2907_v34  ;;  %v2899_v35 = vld [vmem:[#allocation2 + $0x38] sm:$0xff] }
 0x18b   : > { %3854 = vmatmul.mubr.msk.bf16.gmra.mrb[12].mxu0 %vm2935_vm11, %v2899_v35 }
 0x1a1   : > { %v3859_v37 = vpop.f32.mrb[0].mxu1 }
 0x1a2   : > { %v3843_v38 = vpop.f32.mrb[0].mxu0  ;;  %v3095_v39 = vadd.f32 %v3859_v37, %v4884_v36  ;;  %v3086_v40 = vpop.f32.mrb[1].mxu1 }
 0x1a3   : > { %v3031_v41 = vadd.f32 %v3843_v38, %v4884_v36  ;;  %v3022_v42 = vpop.f32.mrb[1].mxu0  ;;  %v3087_v43 = vadd.f32 %v4884_v36, %v3086_v40  ;;  %v3860_v44 = vpop.f32.mrb[2].mxu1 }
 0x1a4   : > { %3168 = vst.msk [vmem:[%s4889_s16 + $0x90] sm:$0xff] %vm3149_vm13, %v3095_v39  ;;  %v3023_v45 = vadd.f32 %v4884_v36, %v3022_v42  ;;  %v3844_v46 = vpop.f32.mrb[2].mxu0  ;;  %v3098_v47 = vadd.f32 %v3860_v44, %v4884_v36  ;;  %v3089_v48 = vpop.f32.mrb[3].mxu1 }
 0x1a5   : > { %3152 = vst.msk [vmem:[%s4889_s16 + $0x10] sm:$0xff] %vm3149_vm13, %v3031_v41  ;;  %3166 = vst.msk [vmem:[%s4889_s16 + $0x80] sm:$0xff] %vm3149_vm13, %v3087_v43  ;;  %v3034_v49 = vadd.f32 %v3844_v46, %v4884_v36  ;;  %v3025_v50 = vpop.f32.mrb[3].mxu0  ;;  %v3090_v51 = vadd.f32 %v4884_v36, %v3089_v48 }
 0x1a6   : > { %3150 = vst.msk [vmem:[%s4889_s16] sm:$0xff] %vm3149_vm13, %v3023_v45  ;;  %3169 = vst.msk [vmem:[%s4889_s16 + $0x98] sm:$0xff] %vm3149_vm13, %v3098_v47  ;;  %v3026_v52 = vadd.f32 %v4884_v36, %v3025_v50 }
 0x1a7   : > { %3153 = vst.msk [vmem:[%s4889_s16 + $0x18] sm:$0xff] %vm3149_vm13, %v3034_v49  ;;  %3167 = vst.msk [vmem:[%s4889_s16 + $0x88] sm:$0xff] %vm3149_vm13, %v3090_v51 }
 0x1a8   : > { %3151 = vst.msk [vmem:[%s4889_s16 + $0x8] sm:$0xff] %vm3149_vm13, %v3026_v52 }
 0x1e1   : > { %v3863_v54 = vpop.f32.mrb[4].mxu1 }
 0x1e2   : > { %v3847_v53 = vpop.f32.mrb[4].mxu0  ;;  %v3111_v56 = vadd.f32 %v3863_v54, %v4884_v36  ;;  %v3102_v58 = vpop.f32.mrb[5].mxu1 }
 0x1e3   : > { %v3047_v55 = vadd.f32 %v3847_v53, %v4884_v36  ;;  %v3038_v57 = vpop.f32.mrb[5].mxu0  ;;  %v3103_v60 = vadd.f32 %v4884_v36, %v3102_v58  ;;  %v3864_v62 = vpop.f32.mrb[6].mxu1 }
 0x1e4   : > { %v3039_v59 = vadd.f32 %v4884_v36, %v3038_v57  ;;  %v3848_v61 = vpop.f32.mrb[6].mxu0  ;;  %3172 = vst.msk [vmem:[%s4889_s16 + $0xb0] sm:$0xff] %vm3149_vm13, %v3111_v56  ;;  %v3114_v1 = vadd.f32 %v3864_v62, %v4884_v36  ;;  %v3105_v3 = vpop.f32.mrb[7].mxu1 }
 0x1e5   : > { %3156 = vst.msk [vmem:[%s4889_s16 + $0x30] sm:$0xff] %vm3149_vm13, %v3047_v55  ;;  %v3050_v0 = vadd.f32 %v3848_v61, %v4884_v36  ;;  %v3041_v2 = vpop.f32.mrb[7].mxu0  ;;  %3170 = vst.msk [vmem:[%s4889_s16 + $0xa0] sm:$0xff] %vm3149_vm13, %v3103_v60  ;;  %v3106_v5 = vadd.f32 %v4884_v36, %v3105_v3 }
 0x1e6   : > { %3154 = vst.msk [vmem:[%s4889_s16 + $0x20] sm:$0xff] %vm3149_vm13, %v3039_v59  ;;  %v3042_v4 = vadd.f32 %v4884_v36, %v3041_v2  ;;  %3173 = vst.msk [vmem:[%s4889_s16 + $0xb8] sm:$0xff] %vm3149_vm13, %v3114_v1 }
 0x1e7   : > { %3157 = vst.msk [vmem:[%s4889_s16 + $0x38] sm:$0xff] %vm3149_vm13, %v3050_v0  ;;  %3171 = vst.msk [vmem:[%s4889_s16 + $0xa8] sm:$0xff] %vm3149_vm13, %v3106_v5 }
 0x1e8   : > { %3155 = vst.msk [vmem:[%s4889_s16 + $0x28] sm:$0xff] %vm3149_vm13, %v3042_v4 }
 0x221   : > { %v3867_v6 = vpop.f32.mrb[8].mxu1 }
 0x222   : > { %v3127_v7 = vadd.f32 %v3867_v6, %v4884_v36  ;;  %v3118_v8 = vpop.f32.mrb[9].mxu1  ;;  %v3851_v14 = vpop.f32.mrb[8].mxu0 }
 0x223   : > { %v3119_v9 = vadd.f32 %v4884_v36, %v3118_v8  ;;  %v3868_v10 = vpop.f32.mrb[10].mxu1  ;;  %v3063_v16 = vadd.f32 %v3851_v14, %v4884_v36  ;;  %v3054_v17 = vpop.f32.mrb[9].mxu0 }
 0x224   : > { %3176 = vst.msk [vmem:[%s4889_s16 + $0xd0] sm:$0xff] %vm3149_vm13, %v3127_v7  ;;  %v3130_v12 = vadd.f32 %v3868_v10, %v4884_v36  ;;  %v3121_v13 = vpop.f32.mrb[11].mxu1  ;;  %v3055_v11 = vadd.f32 %v4884_v36, %v3054_v17  ;;  %v3852_v18 = vpop.f32.mrb[10].mxu0 }
 0x225   : > { %3174 = vst.msk [vmem:[%s4889_s16 + $0xc0] sm:$0xff] %vm3149_vm13, %v3119_v9  ;;  %v3122_v15 = vadd.f32 %v4884_v36, %v3121_v13  ;;  %3160 = vst.msk [vmem:[%s4889_s16 + $0x50] sm:$0xff] %vm3149_vm13, %v3063_v16  ;;  %v3066_v19 = vadd.f32 %v3852_v18, %v4884_v36  ;;  %v3057_v20 = vpop.f32.mrb[11].mxu0 }
 0x226   : > { %3177 = vst.msk [vmem:[%s4889_s16 + $0xd8] sm:$0xff] %vm3149_vm13, %v3130_v12  ;;  %3158 = vst.msk [vmem:[%s4889_s16 + $0x40] sm:$0xff] %vm3149_vm13, %v3055_v11  ;;  %v3058_v21 = vadd.f32 %v4884_v36, %v3057_v20 }
 0x227   : > { %3175 = vst.msk [vmem:[%s4889_s16 + $0xc8] sm:$0xff] %vm3149_vm13, %v3122_v15  ;;  %3161 = vst.msk [vmem:[%s4889_s16 + $0x58] sm:$0xff] %vm3149_vm13, %v3066_v19 }
 0x228   : > { %3159 = vst.msk [vmem:[%s4889_s16 + $0x48] sm:$0xff] %vm3149_vm13, %v3058_v21 }
 0x25d   : > { %v3871_v23 = vpop.f32.mrb[12].mxu1 }
 0x25e   : > { %v3143_v24 = vadd.f32 %v3871_v23, %v4884_v36  ;;  %v3134_v25 = vpop.f32.mrb[13].mxu1  ;;  %v3855_v26 = vpop.f32.mrb[12].mxu0 }
 0x25f   : > { %v3135_v27 = vadd.f32 %v4884_v36, %v3134_v25  ;;  %v3872_v22 = vpop.f32.mrb[14].mxu1  ;;  %v3079_v28 = vadd.f32 %v3855_v26, %v4884_v36  ;;  %v3070_v29 = vpop.f32.mrb[13].mxu0 }
 0x260   : > { %3180 = vst.msk [vmem:[%s4889_s16 + $0xf0] sm:$0xff] %vm3149_vm13, %v3143_v24  ;;  %v3146_v30 = vadd.f32 %v3872_v22, %v4884_v36  ;;  %v3137_v31 = vpop.f32.mrb[15].mxu1  ;;  %v3071_v63 = vadd.f32 %v4884_v36, %v3070_v29  ;;  %v3856_v32 = vpop.f32.mrb[14].mxu0 }
 0x261   : > { %3178 = vst.msk [vmem:[%s4889_s16 + $0xe0] sm:$0xff] %vm3149_vm13, %v3135_v27  ;;  %v3138_v33 = vadd.f32 %v4884_v36, %v3137_v31  ;;  %3164 = vst.msk [vmem:[%s4889_s16 + $0x70] sm:$0xff] %vm3149_vm13, %v3079_v28  ;;  %v3082_v34 = vadd.f32 %v3856_v32, %v4884_v36  ;;  %v3073_v35 = vpop.f32.mrb[15].mxu0 }
 0x262   : > { %3181 = vst.msk [vmem:[%s4889_s16 + $0xf8] sm:$0xff] %vm3149_vm13, %v3146_v30  ;;  %3162 = vst.msk [vmem:[%s4889_s16 + $0x60] sm:$0xff] %vm3149_vm13, %v3071_v63  ;;  %v3074_v37 = vadd.f32 %v4884_v36, %v3073_v35 }
 0x263   : > { %3179 = vst.msk [vmem:[%s4889_s16 + $0xe8] sm:$0xff] %vm3149_vm13, %v3138_v33  ;;  %3165 = vst.msk [vmem:[%s4889_s16 + $0x78] sm:$0xff] %vm3149_vm13, %v3082_v34 }
 0x264   : > { %3163 = vst.msk [vmem:[%s4889_s16 + $0x68] sm:$0xff] %vm3149_vm13, %v3074_v37 }
 0x265 PF: > { %s13_s14 = sadd.s32 1, %s4179_s14   ;;  %s5000_s12 = smov %s4175_s13 }
 0x266   : > { %p10_p5 = scmp.ge.s32.totalorder %s13_s14, 4   ;;  %s5001_s13 = smov %s5003_s15 }
 0x268   :  { %12 = sbr.rel (!%p10_p5) target bundleno = 2 (0x2), region = 70 }

</bundles_post_ra>
